<compile_context>
chip_gen: v6e
topology: v6e:2x2x1
jax: 0.10.0
libtpu: 0.0.40
codegen_flags: <defaults>
</compile_context>

<pallas_src>
import functools

import jax
import jax.numpy as jnp
from jax import lax
from jax.experimental import pallas as pl
from jax.experimental.pallas import tpu as pltpu


# ----------------------------------------------------------------------------
# helpers
# ----------------------------------------------------------------------------
def _round_up(x, m):
    return (x + m - 1) // m * m


def _cdiv(a, b):
    return -(-a // b)


def _chip_config():
    """Per-generation tiling knobs, derived from VMEM capacity.

    v5e/v6e: 128 MiB VMEM, one TensorCore -> big tiles, few grid steps.
    v7x:     64 MiB VMEM, two TensorCores -> smaller tiles, even step count.
    """
    try:
        vmem = int(pltpu.get_tpu_info().vmem_capacity_bytes)
    except Exception:
        vmem = 64 << 20                      # conservative (v7x-like) fallback
    if vmem >= (96 << 20):
        return dict(tm_max=1024, x_budget=64 << 20, vmem_cap=100 << 20,
                    prefer_even_steps=False)
    return dict(tm_max=512, x_budget=20 << 20, vmem_cap=48 << 20,
                prefer_even_steps=True)


def _choose_tm(P, ns, cin, itemsize, cfg):
    """Point tile (lane dimension) per grid step.

    - multiple of 128 so every load/store is full lane width (unmasked vst),
    - as large as the double-buffered x block allows within the chip's budget,
    - on v7x, prefer an EVEN number of grid steps so the "parallel" grid axis
      splits evenly across the two TensorCores.
    """
    lane_p = _round_up(P, 128)
    tm = min(_round_up(cfg["tm_max"], 128), lane_p)
    cin_pad = _round_up(cin, max(1, 32 // itemsize))      # sublane packing
    while tm > 128 and 2 * ns * cin_pad * tm * itemsize > cfg["x_budget"]:
        tm -= 128
    if cfg["prefer_even_steps"] and lane_p >= 256:
        cand = tm
        while cand >= 128:
            if _cdiv(P, cand) % 2 == 0:
                tm = cand
                break
            cand -= 128
    return tm


def _choose_ns_chunk(ns, tm, max_cout, budget_bytes=6 << 20):
    """Largest sample-chunk whose widest f32 layer intermediate fits the budget."""
    chunk = ns
    while chunk > 1 and max_cout * chunk * tm * 4 > budget_bytes:
        chunk -= 1
    return chunk


# ----------------------------------------------------------------------------
# Pallas kernel: fused shared-MLP (matmul + folded-BN bias + ReLU chain) with
# max-pool over the nsample axis.  One kernel per scale.
# ----------------------------------------------------------------------------
def _mlp_maxpool_kernel(nlayers, ns, tm, ns_chunk, compute_dtype, *refs):
    """refs = (x_ref, w_0, b_0, ..., w_{L-1}, b_{L-1}, out_ref).

    x_ref  : (Cin, ns*tm)   compute_dtype  (channels on sublanes, sample-major
                                            blocks of tm lane-dense point columns)
    w_l    : (Cout_l, Cin_l) compute_dtype (1x1 conv weight, BN folded)
    b_l    : (Cout_l, 1)     float32       (BN folded bias)
    out_ref: (Cout_last, tm) float32
    """
    x_ref = refs[0]
    w_refs = refs[1:1 + 2 * nlayers:2]
    b_refs = refs[2:2 + 2 * nlayers:2]
    out_ref = refs[1 + 2 * nlayers]

    # Hoist weight/bias loads out of the chunk loop (unrolled loops would
    # otherwise re-emit the vlds every iteration).
    ws = [w_ref[...] for w_ref in w_refs]
    bs = [b_ref[...] for b_ref in b_refs]

    acc = None
    for c0 in range(0, ns, ns_chunk):
        nc = min(ns_chunk, ns - c0)
        # One (Cout, Cin) @ (Cin, nc*tm) matmul per layer: nsample is batched
        # into the MXU free dimension so per-matmul fill/drain is amortized.
        h = x_ref[:, c0 * tm:(c0 + nc) * tm]
        for l in range(nlayers):
            z = jnp.dot(ws[l], h, preferred_element_type=jnp.float32)
            z = jnp.maximum(z + bs[l], 0.0)                 # bias + ReLU in f32
            h = z if l + 1 == nlayers else z.astype(compute_dtype)
        # Max-pool over nsample: register-carried running max over 128-aligned
        # lane slices (pure VPU, no XLU, no VMEM scratch read-modify-write).
        for s in range(nc):
            seg = h[:, s * tm:(s + 1) * tm]
            acc = seg if acc is None else jnp.maximum(acc, seg)
    out_ref[...] = acc.astype(out_ref.dtype)


def mlp_maxpool(x, weights, biases):
    """Fused shared-MLP + max-pool over nsample.

    x: (P, nsample, Cin) grouped features in compute dtype, P = B*npoint.
    weights[l]: (Cout_l, Cin_l); biases[l]: (Cout_l, 1) float32.
    Returns (Cout_last, P) float32.
    """
    P, ns, cin = x.shape
    nlayers = len(weights)
    cout = int(weights[-1].shape[0])
    max_cout = max(int(w.shape[0]) for w in weights)
    compute_dtype = x.dtype
    itemsize = jnp.dtype(compute_dtype).itemsize

    cfg = _chip_config()
    tm = _choose_tm(P, ns, cin, itemsize, cfg)
    ns_chunk = _choose_ns_chunk(ns, tm, max_cout)

    P_pad = _round_up(P, tm)
    if P_pad != P:
        # Pad the point axis; each output column depends only on its own input
        # column, so padded (zero) columns never pollute real outputs.
        x = jnp.pad(x, ((0, P_pad - P), (0, 0), (0, 0)))
    ntiles = P_pad // tm

    # Lane-dense kernel layout: (Cin, ntiles, ns, tm) flattened to
    # (Cin, ntiles*ns*tm); each grid step gets one contiguous (Cin, ns*tm) slab.
    x_t = (x.reshape(ntiles, tm, ns, cin)
            .transpose(3, 0, 2, 1)
            .reshape(cin, ntiles * ns * tm))

    in_specs = [pl.BlockSpec((cin, ns * tm), lambda i: (0, i))]
    args = [x_t]
    for w, b in zip(weights, biases):
        in_specs.append(pl.BlockSpec(tuple(w.shape), lambda i: (0, 0)))
        in_specs.append(pl.BlockSpec(tuple(b.shape), lambda i: (0, 0)))
        # bf16 weights is a deliberate precision trade vs. the f32 PyTorch
        # module (accumulation stays f32); keep f32 weights if accuracy-critical.
        args.append(w.astype(compute_dtype))
        args.append(b.astype(jnp.float32))

    # Advisory cost estimate so XLA schedules this against the gather/sort glue.
    flops = 2 * P_pad * ns * sum(int(w.shape[0]) * int(w.shape[1]) for w in weights)
    bytes_accessed = (int(x_t.size) * itemsize + P_pad * cout * 4
                      + sum(int(w.size) * itemsize + int(b.size) * 4
                            for w, b in zip(weights, biases)))

    # Explicit VMEM budget: double-buffered x / out blocks + weights + a
    # generous allowance for the compiler-managed layer intermediates.
    sub = max(1, 32 // itemsize)
    x_blk = 2 * _round_up(cin, sub) * ns * tm * itemsize
    out_blk = 2 * _round_up(cout, 8) * tm * 4
    w_blk = sum(2 * (_round_up(int(w.shape[0]), sub) * _round_up(int(w.shape[1]), 128) * itemsize
                     + _round_up(int(b.shape[0]), 8) * 128 * 4)
                for w, b in zip(weights, biases))
    inter = sum(_round_up(int(w.shape[0]), 8) for w in weights) * ns_chunk * tm * (4 + itemsize)
    vmem_limit = int(min(max(x_blk + out_blk + w_blk + 2 * inter + (4 << 20), 32 << 20),
                         cfg["vmem_cap"]))

    kernel = functools.partial(_mlp_maxpool_kernel, nlayers, ns, tm, ns_chunk,
                               compute_dtype)
    out = pl.pallas_call(
        kernel,
        out_shape=jax.ShapeDtypeStruct((cout, P_pad), jnp.float32),
        grid_spec=pltpu.PrefetchScalarGridSpec(
            num_scalar_prefetch=0,
            grid=(ntiles,),
            in_specs=in_specs,
            out_specs=pl.BlockSpec((cout, tm), lambda i: (0, i)),
        ),
        compiler_params=pltpu.CompilerParams(
            dimension_semantics=("parallel",),
            vmem_limit_bytes=vmem_limit),
        cost_estimate=pl.CostEstimate(flops=int(flops), transcendentals=0,
                                      bytes_accessed=int(bytes_accessed)),
    )(*args)
    return out[:, :P]


# ----------------------------------------------------------------------------
# Plain-JAX glue: farthest point sampling, ball query, grouping.
# TODO(synk): FPS (sequential argmax loop) and ball query (full sort) stay in
# plain JAX; the grouped-feature gather + relayout also stays in XLA — an
# in-kernel DMA gather (scalar-prefetched indices + features at pl.ANY) would
# remove the grouped HBM round trip, but per-row DMAs of 16-35-element rows are
# descriptor-bound, so XLA's gather is kept for now.
# ----------------------------------------------------------------------------
def farthest_point_sample(xyz, npoint):
    """xyz: (B, N, 3) -> idx (B, npoint) int32."""
    B, N, _ = xyz.shape

    def body(i, state):
        dists, idxs, farthest = state
        idxs = idxs.at[:, i].set(farthest)
        centroid = jnp.take_along_axis(xyz, farthest[:, None, None], axis=1)
        d = jnp.sum((xyz - centroid) ** 2, axis=-1)
        dists = jnp.minimum(dists, d)
        farthest = jnp.argmax(dists, axis=-1).astype(jnp.int32)
        return dists, idxs, farthest

    dists0 = jnp.full((B, N), 1e10, dtype=xyz.dtype)
    idxs0 = jnp.zeros((B, npoint), dtype=jnp.int32)
    far0 = jnp.zeros((B,), dtype=jnp.int32)
    _, idxs, _ = lax.fori_loop(0, npoint, body, (dists0, idxs0, far0))
    return idxs


def index_points(points, idx):
    """points: (B, N, D), idx: (B, ...) int -> (B, ..., D)."""
    return jax.vmap(lambda p, i: p[i])(points, idx)


def ball_query(radius, nsample, xyz, new_xyz):
    """xyz: (B, N, 3), new_xyz: (B, S, 3) -> idx (B, S, nsample) int32."""
    B, N, _ = xyz.shape
    S = new_xyz.shape[1]
    sqrdists = jnp.sum((new_xyz[:, :, None, :] - xyz[:, None, :, :]) ** 2, -1)
    idx = jnp.broadcast_to(jnp.arange(N, dtype=jnp.int32), (B, S, N))
    idx = jnp.where(sqrdists > radius ** 2, N, idx)
    idx = jnp.sort(idx, axis=-1)[:, :, :nsample]
    first = idx[:, :, 0:1]
    first = jnp.where(first == N, 0, first)    # empty ball -> index 0 (reference behavior)
    idx = jnp.where(idx == N, first, idx)
    return idx


def sample_and_group(radius, nsample, xyz, new_xyz, features, use_xyz=True):
    """Returns (B, npoint, nsample, 3 + C) grouped features (relative xyz first)."""
    idx = ball_query(radius, nsample, xyz, new_xyz)
    grouped_xyz = index_points(xyz, idx) - new_xyz[:, :, None, :]
    grouped_feat = index_points(features, idx)
    if use_xyz:
        return jnp.concatenate([grouped_xyz, grouped_feat], axis=-1)
    return grouped_feat


# ----------------------------------------------------------------------------
# Module: parameter construction + forward.
# ----------------------------------------------------------------------------
def init_params(key, mlp_list, in_channels, use_xyz=True, bn_eps=1e-5):
    """Per-scale (weights, biases): Conv2d-1x1 weight (Cout, Cin) with eval-mode
    BatchNorm folded in via its running statistics (fresh running_mean=0 /
    running_var=1 here; the fold formula uses the stats explicitly so trained
    checkpoints fold correctly too)."""
    params = []
    for spec in mlp_list:
        spec = list(spec)
        spec[0] = in_channels + (3 if use_xyz else 0)
        ws, bs = [], []
        for cin, cout in zip(spec[:-1], spec[1:]):
            key, kw, kg, kb = jax.random.split(key, 4)
            w = jax.random.normal(kw, (cout, cin), jnp.float32) * 0.1
            gamma = 1.0 + 0.01 * jax.random.normal(kg, (cout,), jnp.float32)
            beta = 0.01 * jax.random.normal(kb, (cout,), jnp.float32)
            running_mean = jnp.zeros((cout,), jnp.float32)
            running_var = jnp.ones((cout,), jnp.float32)
            scale = gamma / jnp.sqrt(running_var + bn_eps)
            ws.append(w * scale[:, None])
            bs.append((beta - running_mean * scale).reshape(cout, 1))
        params.append((ws, bs))
    return params


def pointnet_sa_msg_forward(xyz, features, params, npoint, radius_list,
                            nsample_list, use_xyz=True,
                            compute_dtype=jnp.bfloat16):
    """xyz: (B, N, 3), features: (B, N, C)
       -> new_xyz (B, npoint, 3), new_features (B, npoint, sum(mlp[-1]))."""
    B = xyz.shape[0]
    fps_idx = farthest_point_sample(xyz, npoint)
    new_xyz = index_points(xyz, fps_idx)                      # (B, npoint, 3)

    P = B * npoint
    outs = []
    for radius, nsample, (ws, bs) in zip(radius_list, nsample_list, params):
        grouped = sample_and_group(radius, nsample, xyz, new_xyz, features,
                                   use_xyz=use_xyz)           # (B, S, ns, Cin)
        # Cast BEFORE the relayout so the HBM round trip of the transpose is bf16.
        grouped = grouped.astype(compute_dtype)
        ns, cin = grouped.shape[2], grouped.shape[3]
        pooled = mlp_maxpool(grouped.reshape(P, ns, cin), ws, bs)  # (Cout, P) f32
        outs.append(pooled)
    new_features = jnp.concatenate(outs, axis=0)              # (sumC, P)
    new_features = new_features.T.reshape(B, npoint, -1)      # (B, npoint, sumC)
    return new_xyz, new_features


def reference_forward(xyz, features, params, npoint, radius_list, nsample_list,
                      use_xyz=True):
    """Pure-JAX f32 reference of the same math (for verification)."""
    fps_idx = farthest_point_sample(xyz, npoint)
    new_xyz = index_points(xyz, fps_idx)
    outs = []
    for radius, nsample, (ws, bs) in zip(radius_list, nsample_list, params):
        h = sample_and_group(radius, nsample, xyz, new_xyz, features, use_xyz)
        for w, b in zip(ws, bs):
            h = jnp.maximum(jnp.einsum('bsnc,oc->bsno', h, w) + b[:, 0], 0.0)
        outs.append(jnp.max(h, axis=2))                       # max over nsample
    return new_xyz, jnp.concatenate(outs, axis=-1)


if __name__ == "__main__":
    key = jax.random.PRNGKey(0)
    B, N, C = 2, 64, 16
    npoint = 16
    radius_list = [0.2, 0.4]
    nsample_list = [8, 16]
    mlp_list = [[C, 32, 32], [C, 32, 64]]

    k_xyz, k_feat, k_par = jax.random.split(key, 3)
    xyz = jax.random.uniform(k_xyz, (B, N, 3), jnp.float32)
    features = jax.random.normal(k_feat, (B, N, C), jnp.float32)
    params = init_params(k_par, mlp_list, C, use_xyz=True)

    fwd = jax.jit(functools.partial(
        pointnet_sa_msg_forward, npoint=npoint, radius_list=radius_list,
        nsample_list=nsample_list, use_xyz=True))
    new_xyz, new_features = fwd(xyz, features, params)
    jax.block_until_ready((new_xyz, new_features))

    assert new_xyz.shape == (B, npoint, 3)
    assert new_features.shape == (B, npoint, 32 + 64)
    assert bool(jnp.all(jnp.isfinite(new_features)))

    # Verify against the pure-JAX f32 reference (loose tol: bf16 input/weights).
    ref_fwd = jax.jit(functools.partial(
        reference_forward, npoint=npoint, radius_list=radius_list,
        nsample_list=nsample_list, use_xyz=True))
    _, ref_features = ref_fwd(xyz, features, params)
    err = float(jnp.max(jnp.abs(new_features - ref_features)))
    assert err < 0.1, f"mismatch vs reference: max abs err = {err}"

    print("KERNEL_OK")
</pallas_src>

<mosaic_0001>
module attributes {stable_mosaic.version = 11 : i64} {
  func.func @_mlp_maxpool_kernel(%arg0: i32, %arg1: memref<19x1024xbf16, #tpu.memory_space<vmem>>, %arg2: memref<32x19xbf16, #tpu.memory_space<vmem>>, %arg3: memref<32x1xf32, #tpu.memory_space<vmem>>, %arg4: memref<32x32xbf16, #tpu.memory_space<vmem>>, %arg5: memref<32x1xf32, #tpu.memory_space<vmem>>, %arg6: memref<32x128xf32, #tpu.memory_space<vmem>>) attributes {dimension_semantics = [#tpu.dimension_semantics<parallel>], iteration_bounds = array<i64: 1>, scalar_prefetch = 0 : i64, scratch_operands = 0 : i64, tpu.core_type = #tpu.core_type<tc>, window_params = [{transform_indices = @transform_0, window_bounds = array<i64: 19, 1024>}, {pipeline_mode = #tpu.pipeline_mode<synchronous>, transform_indices = @transform_1, window_bounds = array<i64: 32, 19>}, {pipeline_mode = #tpu.pipeline_mode<synchronous>, transform_indices = @transform_2, window_bounds = array<i64: 32, 1>}, {pipeline_mode = #tpu.pipeline_mode<synchronous>, transform_indices = @transform_3, window_bounds = array<i64: 32, 32>}, {pipeline_mode = #tpu.pipeline_mode<synchronous>, transform_indices = @transform_4, window_bounds = array<i64: 32, 1>}, {transform_indices = @transform_5, window_bounds = array<i64: 32, 128>}]} {
    %c0 = arith.constant 0 : index
    %c0_0 = arith.constant 0 : index
    %0 = vector.load %arg2[%c0, %c0_0] : memref<32x19xbf16, #tpu.memory_space<vmem>>, vector<32x19xbf16>
    %c0_1 = arith.constant 0 : index
    %c0_2 = arith.constant 0 : index
    %1 = vector.load %arg4[%c0_1, %c0_2] : memref<32x32xbf16, #tpu.memory_space<vmem>>, vector<32x32xbf16>
    %c0_3 = arith.constant 0 : index
    %c0_4 = arith.constant 0 : index
    %2 = vector.load %arg3[%c0_3, %c0_4] : memref<32x1xf32, #tpu.memory_space<vmem>>, vector<32x1xf32>
    %c0_5 = arith.constant 0 : index
    %c0_6 = arith.constant 0 : index
    %3 = vector.load %arg5[%c0_5, %c0_6] : memref<32x1xf32, #tpu.memory_space<vmem>>, vector<32x1xf32>
    %c0_7 = arith.constant 0 : index
    %c0_8 = arith.constant 0 : index
    %4 = vector.load %arg1[%c0_7, %c0_8] : memref<19x1024xbf16, #tpu.memory_space<vmem>>, vector<19x1024xbf16>
    %cst = arith.constant dense<0.000000e+00> : vector<32x1024xf32>
    %5 = tpu.matmul %0, %4, %cst {dimension_numbers = #tpu.dot_dimension_numbers<[1], [0], [0], [1], [0, 0, 1, 1], [], []>} : vector<32x19xbf16>, vector<19x1024xbf16>, vector<32x1024xf32> -> vector<32x1024xf32>
    %6 = vector.broadcast %2 : vector<32x1xf32> to vector<32x1024xf32>
    %7 = arith.addf %5, %6 : vector<32x1024xf32>
    %cst_9 = arith.constant 0.000000e+00 : f32
    %8 = vector.broadcast %cst_9 : f32 to vector<32x1024xf32>
    %9 = arith.maximumf %7, %8 : vector<32x1024xf32>
    %10 = arith.truncf %9 : vector<32x1024xf32> to vector<32x1024xbf16>
    %cst_10 = arith.constant dense<0.000000e+00> : vector<32x1024xf32>
    %11 = tpu.matmul %1, %10, %cst_10 {dimension_numbers = #tpu.dot_dimension_numbers<[1], [0], [0], [1], [0, 0, 1, 1], [], []>} : vector<32x32xbf16>, vector<32x1024xbf16>, vector<32x1024xf32> -> vector<32x1024xf32>
    %12 = vector.broadcast %3 : vector<32x1xf32> to vector<32x1024xf32>
    %13 = arith.addf %11, %12 : vector<32x1024xf32>
    %cst_11 = arith.constant 0.000000e+00 : f32
    %14 = vector.broadcast %cst_11 : f32 to vector<32x1024xf32>
    %15 = arith.maximumf %13, %14 : vector<32x1024xf32>
    %16 = vector.extract_strided_slice %15 {offsets = [0, 0], sizes = [32, 128], strides = [1, 1]} : vector<32x1024xf32> to vector<32x128xf32>
    %17 = vector.extract_strided_slice %15 {offsets = [0, 128], sizes = [32, 128], strides = [1, 1]} : vector<32x1024xf32> to vector<32x128xf32>
    %18 = arith.maximumf %16, %17 : vector<32x128xf32>
    %19 = vector.extract_strided_slice %15 {offsets = [0, 256], sizes = [32, 128], strides = [1, 1]} : vector<32x1024xf32> to vector<32x128xf32>
    %20 = arith.maximumf %18, %19 : vector<32x128xf32>
    %21 = vector.extract_strided_slice %15 {offsets = [0, 384], sizes = [32, 128], strides = [1, 1]} : vector<32x1024xf32> to vector<32x128xf32>
    %22 = arith.maximumf %20, %21 : vector<32x128xf32>
    %23 = vector.extract_strided_slice %15 {offsets = [0, 512], sizes = [32, 128], strides = [1, 1]} : vector<32x1024xf32> to vector<32x128xf32>
    %24 = arith.maximumf %22, %23 : vector<32x128xf32>
    %25 = vector.extract_strided_slice %15 {offsets = [0, 640], sizes = [32, 128], strides = [1, 1]} : vector<32x1024xf32> to vector<32x128xf32>
    %26 = arith.maximumf %24, %25 : vector<32x128xf32>
    %27 = vector.extract_strided_slice %15 {offsets = [0, 768], sizes = [32, 128], strides = [1, 1]} : vector<32x1024xf32> to vector<32x128xf32>
    %28 = arith.maximumf %26, %27 : vector<32x128xf32>
    %29 = vector.extract_strided_slice %15 {offsets = [0, 896], sizes = [32, 128], strides = [1, 1]} : vector<32x1024xf32> to vector<32x128xf32>
    %30 = arith.maximumf %28, %29 : vector<32x128xf32>
    %c0_12 = arith.constant 0 : index
    %c0_13 = arith.constant 0 : index
    %31 = vector.load %arg6[%c0_12, %c0_13] : memref<32x128xf32, #tpu.memory_space<vmem>>, vector<32x128xf32>
    tpu.vector_store %arg6[%c0_12, %c0_13], %30 {strides = array<i32>} : memref<32x128xf32, #tpu.memory_space<vmem>>, vector<32x128xf32>,
    return
  }
  func.func @transform_0(%arg0: i32) -> (i32, i32) {
    %c0_i32 = arith.constant 0 : i32
    %c0_i32_0 = arith.constant 0 : i32
    return %c0_i32, %arg0 : i32, i32
  }
  func.func @transform_1(%arg0: i32) -> (i32, i32) {
    %c0_i32 = arith.constant 0 : i32
    %c0_i32_0 = arith.constant 0 : i32
    %c0_i32_1 = arith.constant 0 : i32
    return %c0_i32, %c0_i32_0 : i32, i32
  }
  func.func @transform_2(%arg0: i32) -> (i32, i32) {
    %c0_i32 = arith.constant 0 : i32
    %c0_i32_0 = arith.constant 0 : i32
    %c0_i32_1 = arith.constant 0 : i32
    return %c0_i32, %c0_i32_0 : i32, i32
  }
  func.func @transform_3(%arg0: i32) -> (i32, i32) {
    %c0_i32 = arith.constant 0 : i32
    %c0_i32_0 = arith.constant 0 : i32
    %c0_i32_1 = arith.constant 0 : i32
    return %c0_i32, %c0_i32_0 : i32, i32
  }
  func.func @transform_4(%arg0: i32) -> (i32, i32) {
    %c0_i32 = arith.constant 0 : i32
    %c0_i32_0 = arith.constant 0 : i32
    %c0_i32_1 = arith.constant 0 : i32
    return %c0_i32, %c0_i32_0 : i32, i32
  }
  func.func @transform_5(%arg0: i32) -> (i32, i32) {
    %c0_i32 = arith.constant 0 : i32
    %c0_i32_0 = arith.constant 0 : i32
    return %c0_i32, %arg0 : i32, i32
  }
}

module attributes {stable_mosaic.version = 11 : i64} {
  func.func @_mlp_maxpool_kernel(%arg0: i32, %arg1: memref<19x2048xbf16, #tpu.memory_space<vmem>>, %arg2: memref<32x19xbf16, #tpu.memory_space<vmem>>, %arg3: memref<32x1xf32, #tpu.memory_space<vmem>>, %arg4: memref<64x32xbf16, #tpu.memory_space<vmem>>, %arg5: memref<64x1xf32, #tpu.memory_space<vmem>>, %arg6: memref<64x128xf32, #tpu.memory_space<vmem>>) attributes {dimension_semantics = [#tpu.dimension_semantics<parallel>], iteration_bounds = array<i64: 1>, scalar_prefetch = 0 : i64, scratch_operands = 0 : i64, tpu.core_type = #tpu.core_type<tc>, window_params = [{transform_indices = @transform_0, window_bounds = array<i64: 19, 2048>}, {pipeline_mode = #tpu.pipeline_mode<synchronous>, transform_indices = @transform_1, window_bounds = array<i64: 32, 19>}, {pipeline_mode = #tpu.pipeline_mode<synchronous>, transform_indices = @transform_2, window_bounds = array<i64: 32, 1>}, {pipeline_mode = #tpu.pipeline_mode<synchronous>, transform_indices = @transform_3, window_bounds = array<i64: 64, 32>}, {pipeline_mode = #tpu.pipeline_mode<synchronous>, transform_indices = @transform_4, window_bounds = array<i64: 64, 1>}, {transform_indices = @transform_5, window_bounds = array<i64: 64, 128>}]} {
    %c0 = arith.constant 0 : index
    %c0_0 = arith.constant 0 : index
    %0 = vector.load %arg2[%c0, %c0_0] : memref<32x19xbf16, #tpu.memory_space<vmem>>, vector<32x19xbf16>
    %c0_1 = arith.constant 0 : index
    %c0_2 = arith.constant 0 : index
    %1 = vector.load %arg4[%c0_1, %c0_2] : memref<64x32xbf16, #tpu.memory_space<vmem>>, vector<64x32xbf16>
    %c0_3 = arith.constant 0 : index
    %c0_4 = arith.constant 0 : index
    %2 = vector.load %arg3[%c0_3, %c0_4] : memref<32x1xf32, #tpu.memory_space<vmem>>, vector<32x1xf32>
    %c0_5 = arith.constant 0 : index
    %c0_6 = arith.constant 0 : index
    %3 = vector.load %arg5[%c0_5, %c0_6] : memref<64x1xf32, #tpu.memory_space<vmem>>, vector<64x1xf32>
    %c0_7 = arith.constant 0 : index
    %c0_8 = arith.constant 0 : index
    %4 = vector.load %arg1[%c0_7, %c0_8] : memref<19x2048xbf16, #tpu.memory_space<vmem>>, vector<19x2048xbf16>
    %cst = arith.constant dense<0.000000e+00> : vector<32x2048xf32>
    %5 = tpu.matmul %0, %4, %cst {dimension_numbers = #tpu.dot_dimension_numbers<[1], [0], [0], [1], [0, 0, 1, 1], [], []>} : vector<32x19xbf16>, vector<19x2048xbf16>, vector<32x2048xf32> -> vector<32x2048xf32>
    %6 = vector.broadcast %2 : vector<32x1xf32> to vector<32x2048xf32>
    %7 = arith.addf %5, %6 : vector<32x2048xf32>
    %cst_9 = arith.constant 0.000000e+00 : f32
    %8 = vector.broadcast %cst_9 : f32 to vector<32x2048xf32>
    %9 = arith.maximumf %7, %8 : vector<32x2048xf32>
    %10 = arith.truncf %9 : vector<32x2048xf32> to vector<32x2048xbf16>
    %cst_10 = arith.constant dense<0.000000e+00> : vector<64x2048xf32>
    %11 = tpu.matmul %1, %10, %cst_10 {dimension_numbers = #tpu.dot_dimension_numbers<[1], [0], [0], [1], [0, 0, 1, 1], [], []>} : vector<64x32xbf16>, vector<32x2048xbf16>, vector<64x2048xf32> -> vector<64x2048xf32>
    %12 = vector.broadcast %3 : vector<64x1xf32> to vector<64x2048xf32>
    %13 = arith.addf %11, %12 : vector<64x2048xf32>
    %cst_11 = arith.constant 0.000000e+00 : f32
    %14 = vector.broadcast %cst_11 : f32 to vector<64x2048xf32>
    %15 = arith.maximumf %13, %14 : vector<64x2048xf32>
    %16 = vector.extract_strided_slice %15 {offsets = [0, 0], sizes = [64, 128], strides = [1, 1]} : vector<64x2048xf32> to vector<64x128xf32>
    %17 = vector.extract_strided_slice %15 {offsets = [0, 128], sizes = [64, 128], strides = [1, 1]} : vector<64x2048xf32> to vector<64x128xf32>
    %18 = arith.maximumf %16, %17 : vector<64x128xf32>
    %19 = vector.extract_strided_slice %15 {offsets = [0, 256], sizes = [64, 128], strides = [1, 1]} : vector<64x2048xf32> to vector<64x128xf32>
    %20 = arith.maximumf %18, %19 : vector<64x128xf32>
    %21 = vector.extract_strided_slice %15 {offsets = [0, 384], sizes = [64, 128], strides = [1, 1]} : vector<64x2048xf32> to vector<64x128xf32>
    %22 = arith.maximumf %20, %21 : vector<64x128xf32>
    %23 = vector.extract_strided_slice %15 {offsets = [0, 512], sizes = [64, 128], strides = [1, 1]} : vector<64x2048xf32> to vector<64x128xf32>
    %24 = arith.maximumf %22, %23 : vector<64x128xf32>
    %25 = vector.extract_strided_slice %15 {offsets = [0, 640], sizes = [64, 128], strides = [1, 1]} : vector<64x2048xf32> to vector<64x128xf32>
    %26 = arith.maximumf %24, %25 : vector<64x128xf32>
    %27 = vector.extract_strided_slice %15 {offsets = [0, 768], sizes = [64, 128], strides = [1, 1]} : vector<64x2048xf32> to vector<64x128xf32>
    %28 = arith.maximumf %26, %27 : vector<64x128xf32>
    %29 = vector.extract_strided_slice %15 {offsets = [0, 896], sizes = [64, 128], strides = [1, 1]} : vector<64x2048xf32> to vector<64x128xf32>
    %30 = arith.maximumf %28, %29 : vector<64x128xf32>
    %31 = vector.extract_strided_slice %15 {offsets = [0, 1024], sizes = [64, 128], strides = [1, 1]} : vector<64x2048xf32> to vector<64x128xf32>
    %32 = arith.maximumf %30, %31 : vector<64x128xf32>
    %33 = vector.extract_strided_slice %15 {offsets = [0, 1152], sizes = [64, 128], strides = [1, 1]} : vector<64x2048xf32> to vector<64x128xf32>
    %34 = arith.maximumf %32, %33 : vector<64x128xf32>
    %35 = vector.extract_strided_slice %15 {offsets = [0, 1280], sizes = [64, 128], strides = [1, 1]} : vector<64x2048xf32> to vector<64x128xf32>
    %36 = arith.maximumf %34, %35 : vector<64x128xf32>
    %37 = vector.extract_strided_slice %15 {offsets = [0, 1408], sizes = [64, 128], strides = [1, 1]} : vector<64x2048xf32> to vector<64x128xf32>
    %38 = arith.maximumf %36, %37 : vector<64x128xf32>
    %39 = vector.extract_strided_slice %15 {offsets = [0, 1536], sizes = [64, 128], strides = [1, 1]} : vector<64x2048xf32> to vector<64x128xf32>
    %40 = arith.maximumf %38, %39 : vector<64x128xf32>
    %41 = vector.extract_strided_slice %15 {offsets = [0, 1664], sizes = [64, 128], strides = [1, 1]} : vector<64x2048xf32> to vector<64x128xf32>
    %42 = arith.maximumf %40, %41 : vector<64x128xf32>
    %43 = vector.extract_strided_slice %15 {offsets = [0, 1792], sizes = [64, 128], strides = [1, 1]} : vector<64x2048xf32> to vector<64x128xf32>
    %44 = arith.maximumf %42, %43 : vector<64x128xf32>
    %45 = vector.extract_strided_slice %15 {offsets = [0, 1920], sizes = [64, 128], strides = [1, 1]} : vector<64x2048xf32> to vector<64x128xf32>
    %46 = arith.maximumf %44, %45 : vector<64x128xf32>
    %c0_12 = arith.constant 0 : index
    %c0_13 = arith.constant 0 : index
    %47 = vector.load %arg6[%c0_12, %c0_13] : memref<64x128xf32, #tpu.memory_space<vmem>>, vector<64x128xf32>
    tpu.vector_store %arg6[%c0_12, %c0_13], %46 {strides = array<i32>} : memref<64x128xf32, #tpu.memory_space<vmem>>, vector<64x128xf32>,
    return
  }
  func.func @transform_0(%arg0: i32) -> (i32, i32) {
    %c0_i32 = arith.constant 0 : i32
    %c0_i32_0 = arith.constant 0 : i32
    return %c0_i32, %arg0 : i32, i32
  }
  func.func @transform_1(%arg0: i32) -> (i32, i32) {
    %c0_i32 = arith.constant 0 : i32
    %c0_i32_0 = arith.constant 0 : i32
    %c0_i32_1 = arith.constant 0 : i32
    return %c0_i32, %c0_i32_0 : i32, i32
  }
  func.func @transform_2(%arg0: i32) -> (i32, i32) {
    %c0_i32 = arith.constant 0 : i32
    %c0_i32_0 = arith.constant 0 : i32
    %c0_i32_1 = arith.constant 0 : i32
    return %c0_i32, %c0_i32_0 : i32, i32
  }
  func.func @transform_3(%arg0: i32) -> (i32, i32) {
    %c0_i32 = arith.constant 0 : i32
    %c0_i32_0 = arith.constant 0 : i32
    %c0_i32_1 = arith.constant 0 : i32
    return %c0_i32, %c0_i32_0 : i32, i32
  }
  func.func @transform_4(%arg0: i32) -> (i32, i32) {
    %c0_i32 = arith.constant 0 : i32
    %c0_i32_0 = arith.constant 0 : i32
    %c0_i32_1 = arith.constant 0 : i32
    return %c0_i32, %c0_i32_0 : i32, i32
  }
  func.func @transform_5(%arg0: i32) -> (i32, i32) {
    %c0_i32 = arith.constant 0 : i32
    %c0_i32_0 = arith.constant 0 : i32
    return %c0_i32, %arg0 : i32, i32
  }
}

</mosaic_0001>

<bundles_post_ra>
// kernel: custom-call.12
= control target key start
LH: loop header
LB: loop body
LE: loop exit
PB: predicated region body
PF: predicated region fallthrough
CT: control target
= control target key end

     0   :  { %s6_s0 = inlined_call_operand.vmem [shape: f32[2,64], index: 0, kind: output, shape index: {}]  }

// kernel: pointnet_sa_msg_forward.2
= control target key start
LH: loop header
LB: loop body
LE: loop exit
PB: predicated region body
PF: predicated region fallthrough
CT: control target
= control target key end

     0   :  { %vm146_vm0 = vcmask 1040384   ;;  %vm147_vm1 = vcmask 1041408   ;;  %v803_v1 = vmov 65535   ;;  %v804_v5 = vmov 0   ;;  %s1035_s0 = inlined_call_operand.vmem [shape: bf16[19,1024], index: 0, kind: input, shape index: {}]   ;;  %s1036_s1 = inlined_call_operand.vmem [shape: bf16[32,19], index: 1, kind: input, shape index: {}]   ;;  %s1037_s2 = inlined_call_operand.vmem [shape: f32[32,1], index: 2, kind: input, shape index: {}]   ;;  %s1038_s4 = inlined_call_operand.vmem [shape: f32[32,1], index: 4, kind: input, shape index: {}]   ;;  %s1039_s3 = inlined_call_operand.vmem [shape: bf16[32,32], index: 3, kind: input, shape index: {}]   ;;  %s1040_s5 = inlined_call_operand.vmem [shape: f32[32,128], index: 5, kind: output, shape index: {}]  }
   0x1   :  { %v45_v0 = vld [vmem:[%s1035_s0 + $0x40] sm:$0x33]  ;;  %v148_v2 = vsel %vm146_vm0, 4294967295, %v803_v1  ;;  %v46_v3 = vld [vmem:[%s1035_s0 + $0x48] sm:$0x33]  ;;  %206 = vmatprep.mubr.bf16.mxu0 %v804_v5  ;;  %259 = vmatprep.mubr.bf16.mxu1 %v804_v5  ;;  %v31_v26 = vld [vmem:[%s1037_s2 + $0x10] sm:$0xff] }
   0x2   :  { %v37_v4 = vld [vmem:[%s1035_s0] sm:$0xff]  ;;  %v762_v6 = vcombine.high %v45_v0, %v45_v0  ;;  %v149_v7 = vsel %vm147_vm1, %v148_v2, 0  ;;  %v764_v8 = vcombine.high %v46_v3, %v46_v3  ;;  %v761_v9 = vcombine.low %v45_v0, %v45_v0  ;;  %v38_v11 = vld [vmem:[%s1035_s0 + $0x8] sm:$0xff]  ;;  %789 = vset.pattern.permute.xlu0 %v804_v5  ;;  %790 = vset.pattern.permute.xlu1 %v804_v5  ;;  %v47_v20 = vld [vmem:[%s1035_s0 + $0x50] sm:$0x33] }
   0x3   :  { %v41_v10 = vld [vmem:[%s1035_s0 + $0x20] sm:$0xff]  ;;  %v42_v12 = vld [vmem:[%s1035_s0 + $0x28] sm:$0xff]  ;;  %v763_v13 = vcombine.low %v46_v3, %v46_v3  ;;  %v48_v21 = vld [vmem:[%s1035_s0 + $0x58] sm:$0x33]  ;;  %v766_v22 = vcombine.high %v47_v20, %v47_v20  ;;  %v765_v29 = vcombine.low %v47_v20, %v47_v20  ;;  %61 = vperm.xlu0 %789, %v31_v26   ;;  %vm139_vm2 = vcmask 154624  }
   0x4   :  { %v754_v14 = vcombine.high %v37_v4, %v41_v10  ;;  %v154_v15 = vand.u32 %v762_v6, %v149_v7  ;;  %v160_v16 = vand.u32 %v764_v8, %v149_v7  ;;  %v151_v17 = vand.u32 %v761_v9, %v149_v7  ;;  %v29_v27 = vld [vmem:[%s1037_s2] sm:$0xff]  ;;  %v39_v33 = vld [vmem:[%s1035_s0 + $0x10] sm:$0xff]  ;;  %v40_v35 = vld [vmem:[%s1035_s0 + $0x18] sm:$0xff] }
   0x5   :  { %v756_v18 = vcombine.high %v38_v11, %v42_v12  ;;  %v157_v19 = vand.u32 %v763_v13, %v149_v7  ;;  %v753_v23 = vcombine.low %v37_v4, %v41_v10  ;;  %v755_v24 = vcombine.low %v38_v11, %v42_v12  ;;  %v795_v28 = vld [vmem:[%s1036_s1] sm:$0xff]   ;;  %v43_v34 = vld [vmem:[%s1035_s0 + $0x30] sm:$0xff]  ;;  %51 = vperm.xlu1 %790, %v29_v27   ;;  %v44_v36 = vld [vmem:[%s1035_s0 + $0x38] sm:$0xff] }
   0x6   :  { %186 = vmatprep.subr.bf16.mxu0 %v154_v15  ;;  %239 = vmatprep.subr.bf16.mxu1 %v160_v16  ;;  %v768_v25 = vcombine.high %v48_v21, %v48_v21  ;;  %v166_v30 = vand.u32 %v766_v22, %v149_v7  ;;  %v767_v31 = vcombine.low %v48_v21, %v48_v21  ;;  %v32_v37 = vld [vmem:[%s1037_s2 + $0x18] sm:$0xff]  ;;  %v30_v38 = vld [vmem:[%s1037_s2 + $0x8] sm:$0xff]  ;;  %v33_v43 = vld [vmem:[%s1038_s4] sm:$0xff]  ;;  %vm464_vm3 = vcmask 261120  }
   0x7   :  { %187 = vmatpush1.bf16.msra.mxu0 %v151_v17  ;;  %240 = vmatpush1.bf16.msra.mxu1 %v157_v19  ;;  %v163_v39 = vand.u32 %v765_v29, %v149_v7  ;;  %v758_v41 = vcombine.high %v39_v33, %v43_v34  ;;  %v760_v42 = vcombine.high %v40_v35, %v44_v36  ;;  %v34_v44 = vld [vmem:[%s1038_s4 + $0x8] sm:$0xff]  ;;  %v35_v48 = vld [vmem:[%s1038_s4 + $0x10] sm:$0xff]  ;;  %v36_v49 = vld [vmem:[%s1038_s4 + $0x18] sm:$0xff] }
   0x8   :  { %188 = vmatprep.subr.bf16.mxu0 %v754_v14  ;;  %241 = vmatprep.subr.bf16.mxu1 %v756_v18  ;;  %v172_v32 = vand.u32 %v768_v25, %v149_v7  ;;  %v169_v40 = vand.u32 %v767_v31, %v149_v7  ;;  %v757_v45 = vcombine.low %v39_v33, %v43_v34  ;;  %v796_v47 = vld [vmem:[%s1036_s1 + $0x8] sm:$0xff]  }
   0x9   :  { %66 = vperm.xlu0 %789, %v32_v37   ;;  %56 = vperm.xlu1 %790, %v30_v38   ;;  %v759_v46 = vcombine.low %v40_v35, %v44_v36 }
   0xb   :  { %189 = vmatpush1.bf16.msra.mxu0 %v753_v23  ;;  %242 = vmatpush1.bf16.msra.mxu1 %v755_v24 }
   0xc   :  { %292 = vmatprep.subr.bf16.mxu0 %v166_v30  ;;  %345 = vmatprep.subr.bf16.mxu1 %v172_v32 }
   0xd   :  { %436 = vperm.xlu0 %789, %v33_v43   ;;  %441 = vperm.xlu1 %790, %v34_v44  }
   0xe   :  { %769 = vmatmul.mubr.msk.bf16.vlgmr.msra.gmra.mxu0 %vm139_vm2, %v795_v28  ;;  %771 = vmatmul.mubr.msk.bf16.vlgmr.msra.gmra.mxu1 %vm139_vm2, %v795_v28 }
   0xf   :  { %216 = vmatprep.mubr.bf16.mxu0 %v804_v5  ;;  %269 = vmatprep.mubr.bf16.mxu1 %v804_v5 }
  0x10   :  { %293 = vmatpush1.bf16.msra.mxu0 %v163_v39  ;;  %346 = vmatpush1.bf16.msra.mxu1 %v169_v40 }
  0x11   :  { %294 = vmatprep.subr.bf16.mxu0 %v758_v41  ;;  %347 = vmatprep.subr.bf16.mxu1 %v760_v42 }
  0x12   :  { %446 = vperm.xlu0 %789, %v35_v48   ;;  %451 = vperm.xlu1 %790, %v36_v49  }
  0x14   :  { %295 = vmatpush1.bf16.msra.mxu0 %v757_v45  ;;  %348 = vmatpush1.bf16.msra.mxu1 %v759_v46 }
  0x16   :  { %770 = vmatmul.mubr.msk.bf16.gmra.mxu0 %vm139_vm2, %v796_v47  ;;  %772 = vmatmul.mubr.msk.bf16.gmra.mxu1 %vm139_vm2, %v796_v47 }
  0x17   :  { %312 = vmatprep.mubr.bf16.mxu0 %v804_v5  ;;  %365 = vmatprep.mubr.bf16.mxu1 %v804_v5 }
  0x1e   :  { %773 = vmatmul.mubr.msk.bf16.vlgmr.msra.gmra.mxu0 %vm139_vm2, %v795_v28  ;;  %775 = vmatmul.mubr.msk.bf16.vlgmr.msra.gmra.mxu1 %vm139_vm2, %v795_v28 }
  0x1f   :  { %322 = vmatprep.mubr.bf16.mxu0 %v804_v5  ;;  %375 = vmatprep.mubr.bf16.mxu1 %v804_v5 }
  0x26   :  { %774 = vmatmul.mubr.msk.bf16.gmra.mxu0 %vm139_vm2, %v796_v47  ;;  %776 = vmatmul.mubr.msk.bf16.gmra.mxu1 %vm139_vm2, %v796_v47 }
  0x27   :  { %503 = vmatprep.mubr.bf16.mxu0 %v804_v5  ;;  %556 = vmatprep.mubr.bf16.mxu1 %v804_v5 }
  0x7e   :  { %v921_v56 = vpop.permute.xlu0 %61 }
  0x80   :  { %v923_v57 = vpop.permute.xlu1 %51 }
  0x84   :  { %v925_v0 = vpop.permute.xlu0 %66  ;;  %v927_v1 = vpop.permute.xlu1 %56 }
  0xce   :  { %v208_v50 = vpop.f32.mrf.mxu0  ;;  %v261_v51 = vpop.f32.mrf.mxu1 }
  0xcf   :  { %v262_v2 = vadd.f32 %v261_v51, %v923_v57  ;;  %v209_v32 = vadd.f32 %v208_v50, %v923_v57 }
  0xd0   :  { %v210_v52 = vpop.f32.mrf.mxu0  ;;  %v263_v53 = vpop.f32.mrf.mxu1 }
  0xd1   :  { %v211_v12 = vadd.f32 %v210_v52, %v923_v57  ;;  %v264_v13 = vadd.f32 %v263_v53, %v923_v57  ;;  %v388_v33 = vmax.f32 %v262_v2, 0.0  ;;  %v386_v50 = vmax.f32 %v209_v32, 0.0 }
  0xd2   :  { %v212_v54 = vpop.f32.mrf.mxu0  ;;  %v265_v55 = vpop.f32.mrf.mxu1 }
  0xd3   :  { %v213_v18 = vadd.f32 %v212_v54, %v927_v1  ;;  %v266_v19 = vadd.f32 %v265_v55, %v927_v1  ;;  %v387_v38 = vmax.f32 %v211_v12, 0.0  ;;  %v389_v39 = vmax.f32 %v264_v13, 0.0 }
  0xd4   :  { %v214_v58 = vpop.f32.mrf.mxu0  ;;  %v267_v59 = vpop.f32.mrf.mxu1 }
  0xd5   :  { %v215_v3 = vadd.f32 %v214_v58, %v927_v1  ;;  %v268_v4 = vadd.f32 %v267_v59, %v927_v1  ;;  %v394_v42 = vmax.f32 %v213_v18, 0.0  ;;  %v396_v43 = vmax.f32 %v266_v19, 0.0  ;;  %v952_v59 = vld [vmem:[%s1039_s3] sm:$0xff]  }
  0xd6   :  { %v218_v60 = vpop.f32.mrf.mxu0  ;;  %v271_v61 = vpop.f32.mrf.mxu1 }
  0xd7   :  { %v219_v14 = vadd.f32 %v218_v60, %v921_v56  ;;  %v272_v15 = vadd.f32 %v271_v61, %v921_v56  ;;  %v395_v22 = vmax.f32 %v215_v3, 0.0  ;;  %v397_v23 = vmax.f32 %v268_v4, 0.0 }
  0xd8   :  { %v220_v62 = vpop.f32.mrf.mxu0  ;;  %v273_v63 = vpop.f32.mrf.mxu1  ;;  %v418_v53 = vpack.c.bf16 %v394_v42, %v386_v50  ;;  %v420_v54 = vpack.c.bf16 %v396_v43, %v388_v33 }
  0xd9   :  { %v221_v8 = vadd.f32 %v220_v62, %v921_v56  ;;  %v274_v9 = vadd.f32 %v273_v63, %v921_v56  ;;  %v402_v34 = vmax.f32 %v219_v14, 0.0  ;;  %v404_v35 = vmax.f32 %v272_v15, 0.0  ;;  %v993_v50 = vpop.permute.xlu1 %441 }
  0xda   :  { %v222_v6 = vpop.f32.mrf.mxu0  ;;  %v275_v7 = vpop.f32.mrf.mxu1  ;;  %v419_v48 = vpack.c.bf16 %v395_v22, %v387_v38  ;;  %v421_v49 = vpack.c.bf16 %v397_v23, %v389_v39 }
  0xdb   :  { %v223_v10 = vadd.f32 %v222_v6, %v925_v0  ;;  %v276_v11 = vadd.f32 %v275_v7, %v925_v0  ;;  %v403_v28 = vmax.f32 %v221_v8, 0.0  ;;  %v405_v29 = vmax.f32 %v274_v9, 0.0 }
  0xdc   :  { %v224_v16 = vpop.f32.mrf.mxu0  ;;  %v277_v17 = vpop.f32.mrf.mxu1 }
  0xdd   :  { %v225_v20 = vadd.f32 %v224_v16, %v925_v0  ;;  %v278_v21 = vadd.f32 %v277_v17, %v925_v0  ;;  %v410_v24 = vmax.f32 %v223_v10, 0.0  ;;  %v412_v25 = vmax.f32 %v276_v11, 0.0 }
  0xde   :  { %v944_v26 = vpop.f32.mrf.mxu0  ;;  %v946_v27 = vpop.f32.mrf.mxu1 }
  0xdf   :  { %v411_v30 = vmax.f32 %v225_v20, 0.0  ;;  %v413_v31 = vmax.f32 %v278_v21, 0.0  ;;  %v426_v44 = vpack.c.bf16 %v410_v24, %v402_v34  ;;  %v428_v45 = vpack.c.bf16 %v412_v25, %v404_v35  ;;  %v802_v25 = vld [vmem:[%s1039_s3 + $0x8] sm:$0xff]  }
  0xe0   :  { %v316_v36 = vpop.f32.mrf.mxu0  ;;  %v369_v37 = vpop.f32.mrf.mxu1 }
  0xe1   :  { %v427_v40 = vpack.c.bf16 %v411_v30, %v403_v28  ;;  %v429_v41 = vpack.c.bf16 %v413_v31, %v405_v29  ;;  %v317_v4 = vadd.f32 %v316_v36, %v923_v57  ;;  %v370_v8 = vadd.f32 %v369_v37, %v923_v57 }
  0xe2   :  { %v318_v46 = vpop.f32.mrf.mxu0  ;;  %v371_v47 = vpop.f32.mrf.mxu1 }
  0xe3   :  { %483 = vmatprep.subr.bf16.mxu0 %v427_v40  ;;  %536 = vmatprep.subr.bf16.mxu1 %v429_v41  ;;  %v319_v17 = vadd.f32 %v318_v46, %v927_v1  ;;  %v372_v18 = vadd.f32 %v371_v47, %v927_v1  ;;  %v391_v33 = vmax.f32 %v317_v4, 0.0  ;;  %v393_v34 = vmax.f32 %v370_v8, 0.0  ;;  %v437_v46 = vpop.permute.xlu0 %436 }
  0xe4   :  { %v320_v51 = vpop.f32.mrf.mxu0  ;;  %v373_v52 = vpop.f32.mrf.mxu1  ;;  %484 = vmatpush1.bf16.msra.mxu0 %v426_v44  ;;  %537 = vmatpush1.bf16.msra.mxu1 %v428_v45 }
  0xe5   :  { %485 = vmatprep.subr.bf16.mxu0 %v419_v48  ;;  %538 = vmatprep.subr.bf16.mxu1 %v421_v49  ;;  %v321_v9 = vadd.f32 %v320_v51, %v927_v1  ;;  %v374_v10 = vadd.f32 %v373_v52, %v927_v1  ;;  %v398_v35 = vmax.f32 %v319_v17, 0.0  ;;  %v400_v36 = vmax.f32 %v372_v18, 0.0 }
  0xe6   :  { %v324_v55 = vpop.f32.mrf.mxu0  ;;  %v377_v58 = vpop.f32.mrf.mxu1 }
  0xe7   :  { %v325_v13 = vadd.f32 %v324_v55, %v921_v56  ;;  %v378_v14 = vadd.f32 %v377_v58, %v921_v56  ;;  %v399_v28 = vmax.f32 %v321_v9, 0.0  ;;  %v401_v29 = vmax.f32 %v374_v10, 0.0  ;;  %v1000_v9 = vpop.permute.xlu1 %451 }
  0xe8   :  { %v326_v60 = vpop.f32.mrf.mxu0  ;;  %v379_v61 = vpop.f32.mrf.mxu1  ;;  %486 = vmatpush1.bf16.msra.mxu0 %v418_v53  ;;  %539 = vmatpush1.bf16.msra.mxu1 %v420_v54 }
  0xe9   :  { %v327_v62 = vadd.f32 %v326_v60, %v921_v56  ;;  %v380_v63 = vadd.f32 %v379_v61, %v921_v56  ;;  %v315_v56 = vadd.f32 %v944_v26, %v923_v57  ;;  %v406_v30 = vmax.f32 %v325_v13, 0.0 }
  0xea   :  { %v328_v2 = vpop.f32.mrf.mxu0  ;;  %v381_v3 = vpop.f32.mrf.mxu1  ;;  %v408_v1 = vmax.f32 %v378_v14, 0.0  ;;  %v423_v26 = vpack.c.bf16 %v399_v28, %v391_v33  ;;  %v425_v39 = vpack.c.bf16 %v401_v29, %v393_v34 }
  0xeb   :  { %v329_v6 = vadd.f32 %v328_v2, %v925_v0  ;;  %v382_v7 = vadd.f32 %v381_v3, %v925_v0  ;;  %779 = vmatmul.mubr.msk.bf16.vlgmr.msra.gmra.mxu0 %vm464_vm3, %v952_v59  ;;  %781 = vmatmul.mubr.msk.bf16.vlgmr.msra.gmra.mxu1 %vm464_vm3, %v952_v59  ;;  %v407_v19 = vmax.f32 %v327_v62, 0.0  ;;  %v409_v20 = vmax.f32 %v380_v63, 0.0  ;;  %v997_v2 = vpop.permute.xlu0 %446 }
  0xec   :  { %v330_v11 = vpop.f32.mrf.mxu0  ;;  %v383_v12 = vpop.f32.mrf.mxu1  ;;  %513 = vmatprep.mubr.bf16.mxu0 %v804_v5  ;;  %566 = vmatprep.mubr.bf16.mxu1 %v804_v5 }
  0xed   :  { %v331_v15 = vadd.f32 %v330_v11, %v925_v0  ;;  %v384_v16 = vadd.f32 %v383_v12, %v925_v0  ;;  %v414_v21 = vmax.f32 %v329_v6, 0.0  ;;  %v416_v22 = vmax.f32 %v382_v7, 0.0 }
  0xee   :  { %v368_v0 = vadd.f32 %v946_v27, %v923_v57  ;;  %v390_v57 = vmax.f32 %v315_v56, 0.0 }
  0xef   :  { %v415_v23 = vmax.f32 %v331_v15, 0.0  ;;  %v417_v24 = vmax.f32 %v384_v16, 0.0  ;;  %v430_v37 = vpack.c.bf16 %v414_v21, %v406_v30  ;;  %v432_v38 = vpack.c.bf16 %v416_v22, %v408_v1 }
  0xf0   :  { %v392_v27 = vmax.f32 %v368_v0, 0.0  ;;  %v422_v40 = vpack.c.bf16 %v398_v35, %v390_v57 }
  0xf1   :  { %v431_v31 = vpack.c.bf16 %v415_v23, %v407_v19  ;;  %v433_v32 = vpack.c.bf16 %v417_v24, %v409_v20 }
  0xf2   :  { %v424_v41 = vpack.c.bf16 %v400_v36, %v392_v27 }
  0xf3   :  { %780 = vmatmul.mubr.msk.bf16.gmra.mxu0 %vm464_vm3, %v802_v25  ;;  %782 = vmatmul.mubr.msk.bf16.gmra.mxu1 %vm464_vm3, %v802_v25 }
  0xf4   :  { %589 = vmatprep.subr.bf16.mxu0 %v431_v31  ;;  %642 = vmatprep.subr.bf16.mxu1 %v433_v32 }
  0xf5   :  { %590 = vmatpush1.bf16.msra.mxu0 %v430_v37  ;;  %643 = vmatpush1.bf16.msra.mxu1 %v432_v38 }
  0xf6   :  { %591 = vmatprep.subr.bf16.mxu0 %v423_v26  ;;  %644 = vmatprep.subr.bf16.mxu1 %v425_v39 }
  0xf7   :  { %609 = vmatprep.mubr.bf16.mxu0 %v804_v5  ;;  %662 = vmatprep.mubr.bf16.mxu1 %v804_v5 }
  0xf9   :  { %592 = vmatpush1.bf16.msra.mxu0 %v422_v40  ;;  %645 = vmatpush1.bf16.msra.mxu1 %v424_v41 }
  0xfc   :  { %783 = vmatmul.mubr.msk.bf16.vlgmr.msra.gmra.mxu0 %vm464_vm3, %v952_v59  ;;  %785 = vmatmul.mubr.msk.bf16.vlgmr.msra.gmra.mxu1 %vm464_vm3, %v952_v59 }
  0xfd   :  { %619 = vmatprep.mubr.bf16.mxu0 %v804_v5  ;;  %672 = vmatprep.mubr.bf16.mxu1 %v804_v5 }
 0x104   :  { %784 = vmatmul.mubr.msk.bf16.gmra.mxu0 %vm464_vm3, %v802_v25  ;;  %786 = vmatmul.mubr.msk.bf16.gmra.mxu1 %vm464_vm3, %v802_v25 }
 0x1ab   :  { %v505_v42 = vpop.f32.mrf.mxu0  ;;  %v558_v43 = vpop.f32.mrf.mxu1 }
 0x1ac   :  { %v506_v51 = vadd.f32 %v505_v42, %v437_v46  ;;  %v559_v61 = vadd.f32 %v558_v43, %v437_v46 }
 0x1ad   :  { %v507_v44 = vpop.f32.mrf.mxu0  ;;  %v560_v45 = vpop.f32.mrf.mxu1 }
 0x1ae   :  { %v508_v47 = vadd.f32 %v507_v44, %v437_v46  ;;  %v683_v60 = vmax.f32 %v506_v51, 0.0  ;;  %v685_v13 = vmax.f32 %v559_v61, 0.0  ;;  %v561_v14 = vadd.f32 %v560_v45, %v437_v46 }
 0x1af   :  { %v509_v48 = vpop.f32.mrf.mxu0  ;;  %v562_v49 = vpop.f32.mrf.mxu1 }
 0x1b0   :  { %v684_v5 = vmax.f32 %v508_v47, 0.0  ;;  %v510_v59 = vadd.f32 %v509_v48, %v993_v50  ;;  %v563_v11 = vadd.f32 %v562_v49, %v993_v50  ;;  %v686_v28 = vmax.f32 %v561_v14, 0.0 }
 0x1b1   :  { %v511_v52 = vpop.f32.mrf.mxu0  ;;  %v564_v53 = vpop.f32.mrf.mxu1 }
 0x1b2   :  { %v512_v54 = vadd.f32 %v511_v52, %v993_v50  ;;  %v715_v4 = vmax.f32 %v683_v60, %v684_v5  ;;  %v691_v10 = vmax.f32 %v510_v59, 0.0  ;;  %v565_v18 = vadd.f32 %v564_v53, %v993_v50 }
 0x1b3   :  { %v515_v55 = vpop.f32.mrf.mxu0  ;;  %v568_v58 = vpop.f32.mrf.mxu1  ;;  %v693_v22 = vmax.f32 %v563_v11, 0.0 }
 0x1b4   :  { %v692_v3 = vmax.f32 %v512_v54, 0.0  ;;  %v516_v12 = vadd.f32 %v515_v55, %v997_v2  ;;  %v719_v21 = vmax.f32 %v715_v4, %v685_v13  ;;  %v569_v24 = vadd.f32 %v568_v58, %v997_v2 }
 0x1b5   :  { %v517_v62 = vpop.f32.mrf.mxu0  ;;  %v570_v63 = vpop.f32.mrf.mxu1  ;;  %v694_v1 = vmax.f32 %v565_v18, 0.0 }
 0x1b6   :  { %v518_v6 = vadd.f32 %v517_v62, %v997_v2  ;;  %v716_v17 = vmax.f32 %v691_v10, %v692_v3  ;;  %v699_v23 = vmax.f32 %v516_v12, 0.0  ;;  %v571_v29 = vadd.f32 %v570_v63, %v997_v2 }
 0x1b7   :  { %v519_v7 = vpop.f32.mrf.mxu0  ;;  %v572_v8 = vpop.f32.mrf.mxu1  ;;  %v723_v36 = vmax.f32 %v719_v21, %v686_v28  ;;  %v701_v39 = vmax.f32 %v569_v24, 0.0 }
 0x1b8   :  { %v700_v19 = vmax.f32 %v518_v6, 0.0  ;;  %v520_v25 = vadd.f32 %v519_v7, %v1000_v9  ;;  %v720_v31 = vmax.f32 %v716_v17, %v693_v22  ;;  %v573_v27 = vadd.f32 %v572_v8, %v1000_v9 }
 0x1b9   :  { %v521_v15 = vpop.f32.mrf.mxu0  ;;  %v574_v16 = vpop.f32.mrf.mxu1  ;;  %v702_v43 = vmax.f32 %v571_v29, 0.0 }
 0x1ba   :  { %v522_v20 = vadd.f32 %v521_v15, %v1000_v9  ;;  %v717_v32 = vmax.f32 %v699_v23, %v700_v19  ;;  %v707_v57 = vmax.f32 %v520_v25, 0.0  ;;  %v724_v48 = vmax.f32 %v720_v31, %v694_v1 }
 0x1bb   :  { %v575_v60 = vadd.f32 %v574_v16, %v1000_v9 }
 0x1bc   :  { %v611_v56 = vpop.f32.mrf.mxu0  ;;  %v664_v0 = vpop.f32.mrf.mxu1  ;;  %v708_v33 = vmax.f32 %v522_v20, 0.0  ;;  %v721_v49 = vmax.f32 %v717_v32, %v701_v39 }
 0x1bd   :  { %v612_v30 = vadd.f32 %v611_v56, %v437_v46  ;;  %v665_v38 = vadd.f32 %v664_v0, %v437_v46 }
 0x1be   :  { %v613_v34 = vpop.f32.mrf.mxu0  ;;  %v666_v35 = vpop.f32.mrf.mxu1  ;;  %v718_v51 = vmax.f32 %v707_v57, %v708_v33  ;;  %v725_v10 = vmax.f32 %v721_v49, %v702_v43 }
 0x1bf   :  { %v687_v37 = vmax.f32 %v612_v30, 0.0  ;;  %v614_v26 = vadd.f32 %v613_v34, %v437_v46  ;;  %v667_v40 = vadd.f32 %v666_v35, %v437_v46  ;;  %v689_v5 = vmax.f32 %v665_v38, 0.0 }
 0x1c0   :  { %v615_v41 = vpop.f32.mrf.mxu0  ;;  %v668_v42 = vpop.f32.mrf.mxu1  ;;  %v709_v46 = vmax.f32 %v573_v27, 0.0 }
 0x1c1   :  { %v727_v44 = vmax.f32 %v723_v36, %v687_v37  ;;  %v688_v45 = vmax.f32 %v614_v26, 0.0  ;;  %v616_v47 = vadd.f32 %v615_v41, %v993_v50  ;;  %v669_v52 = vadd.f32 %v668_v42, %v993_v50 }
 0x1c2   :  { %v617_v53 = vpop.f32.mrf.mxu0  ;;  %v670_v54 = vpop.f32.mrf.mxu1  ;;  %v690_v61 = vmax.f32 %v667_v40, 0.0  ;;  %v722_v11 = vmax.f32 %v718_v51, %v709_v46 }
 0x1c3   :  { %v731_v55 = vmax.f32 %v727_v44, %v688_v45  ;;  %v695_v58 = vmax.f32 %v616_v47, 0.0  ;;  %v618_v59 = vadd.f32 %v617_v53, %v993_v50  ;;  %v671_v62 = vadd.f32 %v670_v54, %v993_v50 }
 0x1c4   :  { %v621_v63 = vpop.f32.mrf.mxu0  ;;  %v674_v3 = vpop.f32.mrf.mxu1  ;;  %v697_v12 = vmax.f32 %v669_v52, 0.0  ;;  %v710_v50 = vmax.f32 %v575_v60, 0.0 }
 0x1c5   :  { %v735_v4 = vmax.f32 %v731_v55, %v689_v5  ;;  %v728_v6 = vmax.f32 %v724_v48, %v695_v58  ;;  %v696_v7 = vmax.f32 %v618_v59, 0.0  ;;  %v622_v8 = vadd.f32 %v621_v63, %v997_v2 }
 0x1c6   :  { %v675_v13 = vadd.f32 %v674_v3, %v997_v2  ;;  %v623_v14 = vpop.f32.mrf.mxu0  ;;  %v676_v15 = vpop.f32.mrf.mxu1  ;;  %v698_v20 = vmax.f32 %v671_v62, 0.0  ;;  %v726_v28 = vmax.f32 %v722_v11, %v710_v50 }
 0x1c7   :  { %v739_v17 = vmax.f32 %v735_v4, %v690_v61  ;;  %v732_v18 = vmax.f32 %v728_v6, %v696_v7  ;;  %v703_v16 = vmax.f32 %v622_v8, 0.0  ;;  %v624_v19 = vadd.f32 %v623_v14, %v997_v2 }
 0x1c8   :  { %v677_v21 = vadd.f32 %v676_v15, %v997_v2  ;;  %v625_v22 = vpop.f32.mrf.mxu0  ;;  %v678_v23 = vpop.f32.mrf.mxu1  ;;  %v705_v29 = vmax.f32 %v675_v13, 0.0 }
 0x1c9   :  { %743 = vst [vmem:[%s1040_s5] sm:$0xff] %v739_v17  ;;  %v736_v24 = vmax.f32 %v732_v18, %v697_v12  ;;  %v729_v25 = vmax.f32 %v725_v10, %v703_v16  ;;  %v704_v56 = vmax.f32 %v624_v19, 0.0  ;;  %v626_v0 = vadd.f32 %v625_v22, %v1000_v9 }
 0x1ca   :  { %v679_v30 = vadd.f32 %v678_v23, %v1000_v9  ;;  %v627_v1 = vpop.f32.mrf.mxu0  ;;  %v680_v31 = vpop.f32.mrf.mxu1  ;;  %v706_v35 = vmax.f32 %v677_v21, 0.0 }
 0x1cb   :  { %v740_v32 = vmax.f32 %v736_v24, %v698_v20  ;;  %v733_v33 = vmax.f32 %v729_v25, %v704_v56  ;;  %v711_v2 = vmax.f32 %v626_v0, 0.0  ;;  %v628_v34 = vadd.f32 %v627_v1, %v1000_v9 }
 0x1cc   :  { %v681_v26 = vadd.f32 %v680_v31, %v1000_v9  ;;  %v713_v57 = vmax.f32 %v679_v30, 0.0 }
 0x1cd   :  { %744 = vst [vmem:[%s1040_s5 + $0x8] sm:$0xff] %v740_v32  ;;  %v737_v36 = vmax.f32 %v733_v33, %v705_v29  ;;  %v730_v37 = vmax.f32 %v726_v28, %v711_v2  ;;  %v712_v38 = vmax.f32 %v628_v34, 0.0 }
 0x1ce   :  { %v714_v40 = vmax.f32 %v681_v26, 0.0 }
 0x1cf   :  { %v741_v39 = vmax.f32 %v737_v36, %v706_v35  ;;  %v734_v27 = vmax.f32 %v730_v37, %v712_v38 }
 0x1d1   :  { %745 = vst [vmem:[%s1040_s5 + $0x10] sm:$0xff] %v741_v39  ;;  %v738_v41 = vmax.f32 %v734_v27, %v713_v57 }
 0x1d3   :  { %v742_v42 = vmax.f32 %v738_v41, %v714_v40 }
 0x1d5   :  { %746 = vst [vmem:[%s1040_s5 + $0x18] sm:$0xff] %v742_v42 }

// kernel: pointnet_sa_msg_forward.3
= control target key start
LH: loop header
LB: loop body
LE: loop exit
PB: predicated region body
PF: predicated region fallthrough
CT: control target
= control target key end

     0   :  { %vm226_vm0 = vcmask 1040384   ;;  %vm227_vm1 = vcmask 1041408   ;;  %v1827_v1 = vmov 65535   ;;  %v1828_v5 = vmov 0   ;;  %s2588_s0 = inlined_call_operand.vmem [shape: bf16[19,2048], index: 0, kind: input, shape index: {}]   ;;  %s2589_s1 = inlined_call_operand.vmem [shape: bf16[32,19], index: 1, kind: input, shape index: {}]   ;;  %s2590_s2 = inlined_call_operand.vmem [shape: f32[32,1], index: 2, kind: input, shape index: {}]   ;;  %s2591_s4 = inlined_call_operand.vmem [shape: f32[64,1], index: 4, kind: input, shape index: {}]   ;;  %s2592_s3 = inlined_call_operand.vmem [shape: bf16[64,32], index: 3, kind: input, shape index: {}]   ;;  %s2593_s5 = inlined_call_operand.vmem [shape: f32[64,128], index: 5, kind: output, shape index: {}]  }
   0x1   :  { %v61_v0 = vld [vmem:[%s2588_s0 + $0x80] sm:$0x33]  ;;  %v228_v2 = vsel %vm226_vm0, 4294967295, %v1827_v1  ;;  %v62_v3 = vld [vmem:[%s2588_s0 + $0x88] sm:$0x33]  ;;  %310 = vmatprep.mubr.bf16.mxu0 %v1828_v5  ;;  %363 = vmatprep.mubr.bf16.mxu1 %v1828_v5  ;;  %v47_v31 = vld [vmem:[%s2588_s0 + $0x10] sm:$0xff] }
   0x2   :  { %v45_v4 = vld [vmem:[%s2588_s0] sm:$0xff]  ;;  %v1734_v6 = vcombine.high %v61_v0, %v61_v0  ;;  %v1870_v7 = vsel %vm227_vm1, %v228_v2, 0  ;;  %v1736_v8 = vcombine.high %v62_v3, %v62_v3  ;;  %v1733_v9 = vcombine.low %v61_v0, %v61_v0  ;;  %v46_v11 = vld [vmem:[%s2588_s0 + $0x8] sm:$0xff]  ;;  %1803 = vset.pattern.permute.xlu0 %v1828_v5  ;;  %1804 = vset.pattern.permute.xlu1 %v1828_v5  ;;  %v63_v20 = vld [vmem:[%s2588_s0 + $0x90] sm:$0x33] }
   0x3   :  { %v53_v10 = vld [vmem:[%s2588_s0 + $0x40] sm:$0xff]  ;;  %v54_v12 = vld [vmem:[%s2588_s0 + $0x48] sm:$0xff]  ;;  %v1735_v13 = vcombine.low %v62_v3, %v62_v3  ;;  %v64_v21 = vld [vmem:[%s2588_s0 + $0x98] sm:$0x33]  ;;  %v1738_v22 = vcombine.high %v63_v20, %v63_v20  ;;  %v1737_v27 = vcombine.low %v63_v20, %v63_v20  ;;  %vm219_vm2 = vcmask 154624  }
   0x4   :  { %v1718_v14 = vcombine.high %v45_v4, %v53_v10  ;;  %v234_v15 = vand.u32 %v1734_v6, %v1870_v7  ;;  %v240_v16 = vand.u32 %v1736_v8, %v1870_v7  ;;  %v231_v17 = vand.u32 %v1733_v9, %v1870_v7  ;;  %v1896_v26 = vld [vmem:[%s2589_s1] sm:$0xff]   ;;  %v55_v32 = vld [vmem:[%s2588_s0 + $0x50] sm:$0xff]  ;;  %v48_v33 = vld [vmem:[%s2588_s0 + $0x18] sm:$0xff] }
   0x5   :  { %v1720_v18 = vcombine.high %v46_v11, %v54_v12  ;;  %v237_v19 = vand.u32 %v1735_v13, %v1870_v7  ;;  %v1717_v23 = vcombine.low %v45_v4, %v53_v10  ;;  %v1719_v24 = vcombine.low %v46_v11, %v54_v12  ;;  %v56_v34 = vld [vmem:[%s2588_s0 + $0x58] sm:$0xff]  ;;  %v65_v35 = vld [vmem:[%s2588_s0 + $0xa0] sm:$0x33]  ;;  %v66_v36 = vld [vmem:[%s2588_s0 + $0xa8] sm:$0x33] }
   0x6   :  { %290 = vmatprep.subr.bf16.mxu0 %v234_v15  ;;  %343 = vmatprep.subr.bf16.mxu1 %v240_v16  ;;  %v1740_v25 = vcombine.high %v64_v21, %v64_v21  ;;  %v246_v28 = vand.u32 %v1738_v22, %v1870_v7  ;;  %v1739_v29 = vcombine.low %v64_v21, %v64_v21  ;;  %v35_v37 = vld [vmem:[%s2590_s2 + $0x10] sm:$0xff]  ;;  %v36_v44 = vld [vmem:[%s2590_s2 + $0x18] sm:$0xff]  ;;  %v33_v45 = vld [vmem:[%s2590_s2] sm:$0xff]  ;;  %vm858_vm3 = vcmask 261120  }
   0x7   :  { %291 = vmatpush1.bf16.msra.mxu0 %v231_v17  ;;  %344 = vmatpush1.bf16.msra.mxu1 %v237_v19  ;;  %v243_v38 = vand.u32 %v1737_v27, %v1870_v7  ;;  %v1722_v40 = vcombine.high %v47_v31, %v55_v32  ;;  %v1724_v41 = vcombine.high %v48_v33, %v56_v34  ;;  %v1940_v50 = vld [vmem:[%s2589_s1 + $0x8] sm:$0xff]   ;;  %v37_v51 = vld [vmem:[%s2591_s4] sm:$0xff]  ;;  %v39_v58 = vld [vmem:[%s2591_s4 + $0x10] sm:$0xff] }
   0x8   :  { %292 = vmatprep.subr.bf16.mxu0 %v1718_v14  ;;  %345 = vmatprep.subr.bf16.mxu1 %v1720_v18  ;;  %v252_v30 = vand.u32 %v1740_v25, %v1870_v7  ;;  %v249_v39 = vand.u32 %v1739_v29, %v1870_v7  ;;  %v1742_v42 = vcombine.high %v65_v35, %v65_v35  ;;  %v34_v52 = vld [vmem:[%s2590_s2 + $0x8] sm:$0xff]  ;;  %v49_v55 = vld [vmem:[%s2588_s0 + $0x20] sm:$0xff]  ;;  %v67_v61 = vld [vmem:[%s2588_s0 + $0xb0] sm:$0x33] }
   0x9   :  { %v1744_v43 = vcombine.high %v66_v36, %v66_v36  ;;  %81 = vperm.xlu0 %1803, %v35_v37   ;;  %v1721_v46 = vcombine.low %v47_v31, %v55_v32  ;;  %v1723_v47 = vcombine.low %v48_v33, %v56_v34  ;;  %71 = vperm.xlu1 %1804, %v33_v45   ;;  %v57_v56 = vld [vmem:[%s2588_s0 + $0x60] sm:$0xff]  ;;  %v50_v57 = vld [vmem:[%s2588_s0 + $0x28] sm:$0xff]  ;;  %v68_v62 = vld [vmem:[%s2588_s0 + $0xb8] sm:$0x33] }
   0xa   :  { %v258_v48 = vand.u32 %v1742_v42, %v1870_v7  ;;  %v1741_v53 = vcombine.low %v65_v35, %v65_v35  ;;  %v1743_v54 = vcombine.low %v66_v36, %v66_v36  ;;  %v38_v59 = vld [vmem:[%s2591_s4 + $0x8] sm:$0xff]  ;;  %v1726_v1 = vcombine.high %v49_v55, %v57_v56  ;;  %v41_v6 = vld [vmem:[%s2591_s4 + $0x20] sm:$0xff]  ;;  %v40_v8 = vld [vmem:[%s2591_s4 + $0x18] sm:$0xff] }
   0xb   :  { %293 = vmatpush1.bf16.msra.mxu0 %v1717_v23  ;;  %346 = vmatpush1.bf16.msra.mxu1 %v1719_v24  ;;  %v264_v49 = vand.u32 %v1744_v43, %v1870_v7  ;;  %v58_v60 = vld [vmem:[%s2588_s0 + $0x68] sm:$0xff]  ;;  %v1746_v3 = vcombine.high %v67_v61, %v67_v61  ;;  %v1748_v4 = vcombine.high %v68_v62, %v68_v62  ;;  %v43_v13 = vld [vmem:[%s2591_s4 + $0x30] sm:$0xff]  ;;  %v44_v18 = vld [vmem:[%s2591_s4 + $0x38] sm:$0xff] }
   0xc   :  { %396 = vmatprep.subr.bf16.mxu0 %v246_v28  ;;  %449 = vmatprep.subr.bf16.mxu1 %v252_v30  ;;  %v255_v63 = vand.u32 %v1741_v53, %v1870_v7  ;;  %v261_v0 = vand.u32 %v1743_v54, %v1870_v7  ;;  %v1728_v2 = vcombine.high %v50_v57, %v58_v60  ;;  %v42_v14 = vld [vmem:[%s2591_s4 + $0x28] sm:$0xff]  ;;  %v51_v17 = vld [vmem:[%s2588_s0 + $0x30] sm:$0xff]  ;;  %v52_v20 = vld [vmem:[%s2588_s0 + $0x38] sm:$0xff] }
   0xd   :  { %86 = vperm.xlu0 %1803, %v36_v44   ;;  %76 = vperm.xlu1 %1804, %v34_v52   ;;  %v1725_v9 = vcombine.low %v49_v55, %v57_v56  ;;  %v1727_v10 = vcombine.low %v50_v57, %v58_v60  ;;  %v270_v11 = vand.u32 %v1746_v3, %v1870_v7  ;;  %v59_v19 = vld [vmem:[%s2588_s0 + $0x70] sm:$0xff]  ;;  %v60_v21 = vld [vmem:[%s2588_s0 + $0x78] sm:$0xff] }
   0xe   :  { %1749 = vmatmul.mubr.msk.bf16.vlgmr.msra.gmra.mxu0 %vm219_vm2, %v1896_v26  ;;  %1751 = vmatmul.mubr.msk.bf16.vlgmr.msra.gmra.mxu1 %vm219_vm2, %v1896_v26  ;;  %v276_v12 = vand.u32 %v1748_v4, %v1870_v7  ;;  %v1745_v15 = vcombine.low %v67_v61, %v67_v61  ;;  %v1747_v16 = vcombine.low %v68_v62, %v68_v62 }
   0xf   :  { %320 = vmatprep.mubr.bf16.mxu0 %v1828_v5  ;;  %373 = vmatprep.mubr.bf16.mxu1 %v1828_v5  ;;  %v1730_v24 = vcombine.high %v51_v17, %v59_v19  ;;  %v1732_v25 = vcombine.high %v52_v20, %v60_v21  ;;  %v1729_v27 = vcombine.low %v51_v17, %v59_v19 }
  0x10   :  { %397 = vmatpush1.bf16.msra.mxu0 %v243_v38  ;;  %450 = vmatpush1.bf16.msra.mxu1 %v249_v39  ;;  %v267_v22 = vand.u32 %v1745_v15, %v1870_v7  ;;  %v273_v23 = vand.u32 %v1747_v16, %v1870_v7  ;;  %v1731_v28 = vcombine.low %v52_v20, %v60_v21 }
  0x11   :  { %398 = vmatprep.subr.bf16.mxu0 %v1722_v40  ;;  %451 = vmatprep.subr.bf16.mxu1 %v1724_v41 }
  0x12   :  { %800 = vperm.xlu0 %1803, %v37_v51   ;;  %805 = vperm.xlu1 %1804, %v38_v59  }
  0x14   :  { %399 = vmatpush1.bf16.msra.mxu0 %v1721_v46  ;;  %452 = vmatpush1.bf16.msra.mxu1 %v1723_v47 }
  0x15   :  { %502 = vmatprep.subr.bf16.mxu0 %v258_v48  ;;  %555 = vmatprep.subr.bf16.mxu1 %v264_v49 }
  0x16   :  { %1750 = vmatmul.mubr.msk.bf16.gmra.mxu0 %vm219_vm2, %v1940_v50  ;;  %1752 = vmatmul.mubr.msk.bf16.gmra.mxu1 %vm219_vm2, %v1940_v50 }
  0x17   :  { %416 = vmatprep.mubr.bf16.mxu0 %v1828_v5  ;;  %469 = vmatprep.mubr.bf16.mxu1 %v1828_v5 }
  0x18   :  { %810 = vperm.xlu0 %1803, %v39_v58   ;;  %815 = vperm.xlu1 %1804, %v40_v8  }
  0x1c   :  { %820 = vperm.xlu0 %1803, %v41_v6   ;;  %825 = vperm.xlu1 %1804, %v42_v14  }
  0x1e   :  { %1753 = vmatmul.mubr.msk.bf16.vlgmr.msra.gmra.mxu0 %vm219_vm2, %v1896_v26  ;;  %1755 = vmatmul.mubr.msk.bf16.vlgmr.msra.gmra.mxu1 %vm219_vm2, %v1896_v26 }
  0x1f   :  { %426 = vmatprep.mubr.bf16.mxu0 %v1828_v5  ;;  %479 = vmatprep.mubr.bf16.mxu1 %v1828_v5 }
  0x20   :  { %503 = vmatpush1.bf16.msra.mxu0 %v255_v63  ;;  %556 = vmatpush1.bf16.msra.mxu1 %v261_v0 }
  0x21   :  { %504 = vmatprep.subr.bf16.mxu0 %v1726_v1  ;;  %557 = vmatprep.subr.bf16.mxu1 %v1728_v2 }
  0x22   :  { %830 = vperm.xlu0 %1803, %v43_v13   ;;  %835 = vperm.xlu1 %1804, %v44_v18  }
  0x24   :  { %505 = vmatpush1.bf16.msra.mxu0 %v1725_v9  ;;  %558 = vmatpush1.bf16.msra.mxu1 %v1727_v10 }
  0x25   :  { %608 = vmatprep.subr.bf16.mxu0 %v270_v11  ;;  %661 = vmatprep.subr.bf16.mxu1 %v276_v12 }
  0x26   :  { %1754 = vmatmul.mubr.msk.bf16.gmra.mxu0 %vm219_vm2, %v1940_v50  ;;  %1756 = vmatmul.mubr.msk.bf16.gmra.mxu1 %vm219_vm2, %v1940_v50 }
  0x27   :  { %522 = vmatprep.mubr.bf16.mxu0 %v1828_v5  ;;  %575 = vmatprep.mubr.bf16.mxu1 %v1828_v5 }
  0x2e   :  { %1757 = vmatmul.mubr.msk.bf16.vlgmr.msra.gmra.mxu0 %vm219_vm2, %v1896_v26  ;;  %1759 = vmatmul.mubr.msk.bf16.vlgmr.msra.gmra.mxu1 %vm219_vm2, %v1896_v26 }
  0x2f   :  { %532 = vmatprep.mubr.bf16.mxu0 %v1828_v5  ;;  %585 = vmatprep.mubr.bf16.mxu1 %v1828_v5 }
  0x30   :  { %609 = vmatpush1.bf16.msra.mxu0 %v267_v22  ;;  %662 = vmatpush1.bf16.msra.mxu1 %v273_v23 }
  0x31   :  { %610 = vmatprep.subr.bf16.mxu0 %v1730_v24  ;;  %663 = vmatprep.subr.bf16.mxu1 %v1732_v25 }
  0x34   :  { %611 = vmatpush1.bf16.msra.mxu0 %v1729_v27  ;;  %664 = vmatpush1.bf16.msra.mxu1 %v1731_v28 }
  0x36   :  { %1758 = vmatmul.mubr.msk.bf16.gmra.mxu0 %vm219_vm2, %v1940_v50  ;;  %1760 = vmatmul.mubr.msk.bf16.gmra.mxu1 %vm219_vm2, %v1940_v50 }
  0x37   :  { %628 = vmatprep.mubr.bf16.mxu0 %v1828_v5  ;;  %681 = vmatprep.mubr.bf16.mxu1 %v1828_v5 }
  0x3e   :  { %1761 = vmatmul.mubr.msk.bf16.vlgmr.msra.gmra.mxu0 %vm219_vm2, %v1896_v26  ;;  %1763 = vmatmul.mubr.msk.bf16.vlgmr.msra.gmra.mxu1 %vm219_vm2, %v1896_v26 }
  0x3f   :  { %638 = vmatprep.mubr.bf16.mxu0 %v1828_v5  ;;  %691 = vmatprep.mubr.bf16.mxu1 %v1828_v5 }
  0x46   :  { %1762 = vmatmul.mubr.msk.bf16.gmra.mxu0 %vm219_vm2, %v1940_v50  ;;  %1764 = vmatmul.mubr.msk.bf16.gmra.mxu1 %vm219_vm2, %v1940_v50 }
  0x47   :  { %903 = vmatprep.mubr.bf16.mxu0 %v1828_v5  ;;  %976 = vmatprep.mubr.bf16.mxu1 %v1828_v5 }
  0x84   :  { %v2047_v33 = vpop.permute.xlu0 %81  ;;  %v2049_v34 = vpop.permute.xlu1 %71 }
  0x88   :  { %v2051_v41 = vpop.permute.xlu0 %86  ;;  %v2053_v42 = vpop.permute.xlu1 %76 }
  0xce   :  { %v312_v7 = vpop.f32.mrf.mxu0  ;;  %v365_v29 = vpop.f32.mrf.mxu1 }
  0xcf   :  { %v366_v43 = vadd.f32 %v365_v29, %v2049_v34  ;;  %v313_v10 = vadd.f32 %v312_v7, %v2049_v34 }
  0xd0   :  { %v314_v30 = vpop.f32.mrf.mxu0  ;;  %v367_v31 = vpop.f32.mrf.mxu1 }
  0xd1   :  { %v315_v52 = vadd.f32 %v314_v30, %v2049_v34  ;;  %v368_v53 = vadd.f32 %v367_v31, %v2049_v34  ;;  %v704_v11 = vmax.f32 %v366_v43, 0.0  ;;  %v702_v7 = vmax.f32 %v313_v10, 0.0 }
  0xd2   :  { %v316_v32 = vpop.f32.mrf.mxu0  ;;  %v369_v26 = vpop.f32.mrf.mxu1 }
  0xd3   :  { %v317_v58 = vadd.f32 %v316_v32, %v2053_v42  ;;  %v370_v59 = vadd.f32 %v369_v26, %v2053_v42  ;;  %v703_v16 = vmax.f32 %v315_v52, 0.0  ;;  %v705_v17 = vmax.f32 %v368_v53, 0.0 }
  0xd4   :  { %v318_v35 = vpop.f32.mrf.mxu0  ;;  %v371_v36 = vpop.f32.mrf.mxu1 }
  0xd5   :  { %v319_v44 = vadd.f32 %v318_v35, %v2053_v42  ;;  %v372_v45 = vadd.f32 %v371_v36, %v2053_v42  ;;  %v718_v20 = vmax.f32 %v317_v58, 0.0  ;;  %v720_v21 = vmax.f32 %v370_v59, 0.0  ;;  %v2078_v36 = vld [vmem:[%s2592_s3] sm:$0xff]  }
  0xd6   :  { %v322_v37 = vpop.f32.mrf.mxu0  ;;  %v375_v38 = vpop.f32.mrf.mxu1 }
  0xd7   :  { %v323_v54 = vadd.f32 %v322_v37, %v2047_v33  ;;  %v376_v55 = vadd.f32 %v375_v38, %v2047_v33  ;;  %v719_v62 = vmax.f32 %v319_v44, 0.0  ;;  %v721_v63 = vmax.f32 %v372_v45, 0.0 }
  0xd8   :  { %v324_v39 = vpop.f32.mrf.mxu0  ;;  %v377_v40 = vpop.f32.mrf.mxu1  ;;  %v766_v31 = vpack.c.bf16 %v718_v20, %v702_v7  ;;  %v768_v32 = vpack.c.bf16 %v720_v21, %v704_v11 }
  0xd9   :  { %v325_v48 = vadd.f32 %v324_v39, %v2047_v33  ;;  %v378_v49 = vadd.f32 %v377_v40, %v2047_v33  ;;  %v734_v12 = vmax.f32 %v323_v54, 0.0  ;;  %v736_v13 = vmax.f32 %v376_v55, 0.0 }
  0xda   :  { %v326_v46 = vpop.f32.mrf.mxu0  ;;  %v379_v47 = vpop.f32.mrf.mxu1  ;;  %v767_v27 = vpack.c.bf16 %v719_v62, %v703_v16  ;;  %v769_v28 = vpack.c.bf16 %v721_v63, %v705_v17 }
  0xdb   :  { %v327_v50 = vadd.f32 %v326_v46, %v2051_v41  ;;  %v380_v51 = vadd.f32 %v379_v47, %v2051_v41  ;;  %v735_v4 = vmax.f32 %v325_v48, 0.0  ;;  %v737_v6 = vmax.f32 %v378_v49, 0.0 }
  0xdc   :  { %v328_v56 = vpop.f32.mrf.mxu0  ;;  %v381_v57 = vpop.f32.mrf.mxu1 }
  0xdd   :  { %v329_v60 = vadd.f32 %v328_v56, %v2051_v41  ;;  %v382_v61 = vadd.f32 %v381_v57, %v2051_v41  ;;  %v750_v0 = vmax.f32 %v327_v50, 0.0  ;;  %v752_v1 = vmax.f32 %v380_v51, 0.0 }
  0xde   :  { %v2070_v2 = vpop.f32.mrf.mxu0  ;;  %v2072_v3 = vpop.f32.mrf.mxu1 }
  0xdf   :  { %v751_v8 = vmax.f32 %v329_v60, 0.0  ;;  %v753_v9 = vmax.f32 %v382_v61, 0.0  ;;  %v782_v22 = vpack.c.bf16 %v750_v0, %v734_v12  ;;  %v784_v23 = vpack.c.bf16 %v752_v1, %v736_v13 }
  0xe0   :  { %v420_v14 = vpop.f32.mrf.mxu0  ;;  %v473_v15 = vpop.f32.mrf.mxu1  ;;  %v472_v17 = vadd.f32 %v2072_v3, %v2049_v34 }
  0xe1   :  { %v783_v18 = vpack.c.bf16 %v751_v8, %v735_v4  ;;  %v785_v19 = vpack.c.bf16 %v753_v9, %v737_v6  ;;  %v421_v47 = vadd.f32 %v420_v14, %v2049_v34  ;;  %v474_v56 = vadd.f32 %v473_v15, %v2049_v34  ;;  %v2106_v4 = vld [vmem:[%s2592_s3 + $0x8] sm:$0xff]  }
  0xe2   :  { %v422_v24 = vpop.f32.mrf.mxu0  ;;  %v475_v25 = vpop.f32.mrf.mxu1  ;;  %v419_v6 = vadd.f32 %v2070_v2, %v2049_v34 }
  0xe3   :  { %883 = vmatprep.subr.bf16.mxu0 %v783_v18  ;;  %956 = vmatprep.subr.bf16.mxu1 %v785_v19  ;;  %v423_v57 = vadd.f32 %v422_v24, %v2053_v42  ;;  %v476_v8 = vadd.f32 %v475_v25, %v2053_v42  ;;  %v707_v18 = vmax.f32 %v421_v47, 0.0  ;;  %v709_v19 = vmax.f32 %v474_v56, 0.0 }
  0xe4   :  { %v424_v29 = vpop.f32.mrf.mxu0  ;;  %v477_v30 = vpop.f32.mrf.mxu1  ;;  %884 = vmatpush1.bf16.msra.mxu0 %v782_v22  ;;  %957 = vmatpush1.bf16.msra.mxu1 %v784_v23  ;;  %v706_v7 = vmax.f32 %v419_v6, 0.0 }
  0xe5   :  { %885 = vmatprep.subr.bf16.mxu0 %v767_v27  ;;  %958 = vmatprep.subr.bf16.mxu1 %v769_v28  ;;  %v425_v48 = vadd.f32 %v424_v29, %v2053_v42  ;;  %v478_v49 = vadd.f32 %v477_v30, %v2053_v42  ;;  %v722_v21 = vmax.f32 %v423_v57, 0.0  ;;  %v724_v24 = vmax.f32 %v476_v8, 0.0 }
  0xe6   :  { %v428_v26 = vpop.f32.mrf.mxu0  ;;  %v481_v35 = vpop.f32.mrf.mxu1  ;;  %v708_v29 = vmax.f32 %v472_v17, 0.0 }
  0xe7   :  { %v429_v52 = vadd.f32 %v428_v26, %v2047_v33  ;;  %v482_v53 = vadd.f32 %v481_v35, %v2047_v33  ;;  %v723_v9 = vmax.f32 %v425_v48, 0.0  ;;  %v725_v10 = vmax.f32 %v478_v49, 0.0  ;;  %v2130_v26 = vld [vmem:[%s2592_s3 + $0x10] sm:$0xff]  }
  0xe8   :  { %v430_v37 = vpop.f32.mrf.mxu0  ;;  %v483_v38 = vpop.f32.mrf.mxu1  ;;  %886 = vmatpush1.bf16.msra.mxu0 %v766_v31  ;;  %959 = vmatpush1.bf16.msra.mxu1 %v768_v32  ;;  %v770_v32 = vpack.c.bf16 %v722_v21, %v706_v7  ;;  %v772_v35 = vpack.c.bf16 %v724_v24, %v708_v29 }
  0xe9   :  { %v431_v39 = vadd.f32 %v430_v37, %v2047_v33  ;;  %v484_v40 = vadd.f32 %v483_v38, %v2047_v33  ;;  %v738_v13 = vmax.f32 %v429_v52, 0.0  ;;  %v740_v14 = vmax.f32 %v482_v53, 0.0 }
  0xea   :  { %v432_v43 = vpop.f32.mrf.mxu0  ;;  %v485_v44 = vpop.f32.mrf.mxu1  ;;  %v771_v25 = vpack.c.bf16 %v723_v9, %v707_v18  ;;  %v773_v27 = vpack.c.bf16 %v725_v10, %v709_v19 }
  0xeb   :  { %v433_v45 = vadd.f32 %v432_v43, %v2051_v41  ;;  %v486_v46 = vadd.f32 %v485_v44, %v2051_v41  ;;  %1769 = vmatmul.mubr.msk.bf16.vlgmr.msra.gmra.mxu0 %vm858_vm3, %v2078_v36  ;;  %1773 = vmatmul.mubr.msk.bf16.vlgmr.msra.gmra.mxu1 %vm858_vm3, %v2078_v36  ;;  %v739_v58 = vmax.f32 %v431_v39, 0.0  ;;  %v741_v59 = vmax.f32 %v484_v40, 0.0 }
  0xec   :  { %v434_v50 = vpop.f32.mrf.mxu0  ;;  %v487_v51 = vpop.f32.mrf.mxu1  ;;  %913 = vmatprep.mubr.bf16.mxu0 %v1828_v5  ;;  %986 = vmatprep.mubr.bf16.mxu1 %v1828_v5 }
  0xed   :  { %v435_v54 = vadd.f32 %v434_v50, %v2051_v41  ;;  %v488_v55 = vadd.f32 %v487_v51, %v2051_v41  ;;  %v754_v62 = vmax.f32 %v433_v45, 0.0  ;;  %v756_v63 = vmax.f32 %v486_v46, 0.0 }
  0xee   :  { %v2099_v60 = vpop.f32.mrf.mxu0  ;;  %v2101_v61 = vpop.f32.mrf.mxu1 }
  0xef   :  { %v755_v0 = vmax.f32 %v435_v54, 0.0  ;;  %v757_v1 = vmax.f32 %v488_v55, 0.0  ;;  %v786_v22 = vpack.c.bf16 %v754_v62, %v738_v13  ;;  %v788_v23 = vpack.c.bf16 %v756_v63, %v740_v14  ;;  %v2149_v55 = vld [vmem:[%s2592_s3 + $0x18] sm:$0xff]  }
  0xf0   :  { %v2111_v11 = vpop.f32.mrf.mxu0  ;;  %v2113_v12 = vpop.f32.mrf.mxu1  ;;  %v525_v24 = vadd.f32 %v2099_v60, %v2049_v34 }
  0xf1   :  { %v787_v15 = vpack.c.bf16 %v755_v0, %v739_v58  ;;  %v789_v16 = vpack.c.bf16 %v757_v1, %v741_v59  ;;  %v527_v9 = vadd.f32 %v2111_v11, %v2049_v34 }
  0xf2   :  { %v2117_v20 = vpop.f32.mrf.mxu0  ;;  %v2119_v2 = vpop.f32.mrf.mxu1 }
  0xf3   :  { %1770 = vmatmul.mubr.msk.bf16.gmra.mxu0 %vm858_vm3, %v2106_v4  ;;  %1774 = vmatmul.mubr.msk.bf16.gmra.mxu1 %vm858_vm3, %v2106_v4  ;;  %v529_v17 = vadd.f32 %v2117_v20, %v2053_v42  ;;  %v582_v11 = vadd.f32 %v2119_v2, %v2053_v42  ;;  %v711_v20 = vmax.f32 %v527_v9, 0.0 }
  0xf4   :  { %1029 = vmatprep.subr.bf16.mxu0 %v787_v15  ;;  %1102 = vmatprep.subr.bf16.mxu1 %v789_v16  ;;  %v530_v3 = vpop.f32.mrf.mxu0  ;;  %v583_v28 = vpop.f32.mrf.mxu1  ;;  %v580_v16 = vadd.f32 %v2113_v12, %v2049_v34  ;;  %v578_v12 = vadd.f32 %v2101_v61, %v2049_v34  ;;  %v710_v61 = vmax.f32 %v525_v24, 0.0 }
  0xf5   :  { %1030 = vmatpush1.bf16.msra.mxu0 %v786_v22  ;;  %1103 = vmatpush1.bf16.msra.mxu1 %v788_v23  ;;  %v531_v62 = vadd.f32 %v530_v3, %v2053_v42  ;;  %v584_v8 = vadd.f32 %v583_v28, %v2053_v42  ;;  %v728_v2 = vmax.f32 %v582_v11, 0.0 }
  0xf6   :  { %1031 = vmatprep.subr.bf16.mxu0 %v771_v25  ;;  %1104 = vmatprep.subr.bf16.mxu1 %v773_v27  ;;  %v534_v30 = vpop.f32.mrf.mxu0  ;;  %v587_v31 = vpop.f32.mrf.mxu1  ;;  %v713_v29 = vmax.f32 %v580_v16, 0.0 }
  0xf7   :  { %923 = vmatprep.mubr.bf16.mxu0 %v1828_v5  ;;  %996 = vmatprep.mubr.bf16.mxu1 %v1828_v5  ;;  %v535_v10 = vadd.f32 %v534_v30, %v2047_v33  ;;  %v588_v13 = vadd.f32 %v587_v31, %v2047_v33  ;;  %v727_v18 = vmax.f32 %v531_v62, 0.0  ;;  %v729_v25 = vmax.f32 %v584_v8, 0.0 }
  0xf8   :  { %v536_v37 = vpop.f32.mrf.mxu0  ;;  %v589_v38 = vpop.f32.mrf.mxu1  ;;  %v726_v30 = vmax.f32 %v529_v17, 0.0 }
  0xf9   :  { %1032 = vmatpush1.bf16.msra.mxu0 %v770_v32  ;;  %1105 = vmatpush1.bf16.msra.mxu1 %v772_v35  ;;  %v537_v43 = vadd.f32 %v536_v37, %v2047_v33  ;;  %v590_v44 = vadd.f32 %v589_v38, %v2047_v33  ;;  %v742_v27 = vmax.f32 %v535_v10, 0.0  ;;  %v744_v3 = vmax.f32 %v588_v13, 0.0 }
  0xfa   :  { %v538_v39 = vpop.f32.mrf.mxu0  ;;  %v591_v40 = vpop.f32.mrf.mxu1  ;;  %v775_v31 = vpack.c.bf16 %v727_v18, %v711_v20 }
  0xfb   :  { %1771 = vmatmul.mubr.msk.bf16.gmra.mxu0 %vm858_vm3, %v2130_v26  ;;  %1775 = vmatmul.mubr.msk.bf16.gmra.mxu1 %vm858_vm3, %v2130_v26  ;;  %v743_v51 = vmax.f32 %v537_v43, 0.0  ;;  %v745_v52 = vmax.f32 %v590_v44, 0.0  ;;  %v539_v63 = vadd.f32 %v538_v39, %v2051_v41  ;;  %v592_v0 = vadd.f32 %v591_v40, %v2051_v41 }
  0xfc   :  { %v540_v45 = vpop.f32.mrf.mxu0  ;;  %v593_v46 = vpop.f32.mrf.mxu1  ;;  %933 = vmatprep.mubr.bf16.mxu0 %v1828_v5  ;;  %1006 = vmatprep.mubr.bf16.mxu1 %v1828_v5  ;;  %v777_v39 = vpack.c.bf16 %v729_v25, %v713_v29  ;;  %v712_v43 = vmax.f32 %v578_v12, 0.0 }
  0xfd   :  { %v541_v47 = vadd.f32 %v540_v45, %v2051_v41  ;;  %v594_v48 = vadd.f32 %v593_v46, %v2051_v41  ;;  %v758_v19 = vmax.f32 %v539_v63, 0.0  ;;  %v760_v21 = vmax.f32 %v592_v0, 0.0  ;;  %v2284_v29 = vpop.permute.xlu1 %805 }
  0xfe   :  { %v2142_v49 = vpop.f32.mrf.mxu0  ;;  %v2144_v50 = vpop.f32.mrf.mxu1 }
  0xff   :  { %v759_v53 = vmax.f32 %v541_v47, 0.0  ;;  %v761_v54 = vmax.f32 %v594_v48, 0.0  ;;  %v790_v32 = vpack.c.bf16 %v758_v19, %v742_v27  ;;  %v792_v35 = vpack.c.bf16 %v760_v21, %v744_v3 }
 0x100   :  { %v2151_v56 = vpop.f32.mrf.mxu0  ;;  %v2153_v57 = vpop.f32.mrf.mxu1  ;;  %v774_v48 = vpack.c.bf16 %v726_v30, %v710_v61  ;;  %v631_v19 = vadd.f32 %v2142_v49, %v2049_v34  ;;  %v684_v21 = vadd.f32 %v2144_v50, %v2049_v34 }
 0x101   :  { %v791_v58 = vpack.c.bf16 %v759_v53, %v743_v51  ;;  %v793_v59 = vpack.c.bf16 %v761_v54, %v745_v52  ;;  %v776_v51 = vpack.c.bf16 %v728_v2, %v712_v43 }
 0x102   :  { %v2158_v1 = vpop.f32.mrf.mxu0  ;;  %v2160_v6 = vpop.f32.mrf.mxu1  ;;  %v714_v49 = vmax.f32 %v631_v19, 0.0 }
 0x103   :  { %1772 = vmatmul.mubr.msk.bf16.gmra.mxu0 %vm858_vm3, %v2149_v55  ;;  %1776 = vmatmul.mubr.msk.bf16.gmra.mxu1 %vm858_vm3, %v2149_v55  ;;  %v688_v16 = vadd.f32 %v2160_v6, %v2053_v42  ;;  %v716_v6 = vmax.f32 %v684_v21, 0.0 }
 0x104   :  { %1175 = vmatprep.subr.bf16.mxu0 %v791_v58  ;;  %1248 = vmatprep.subr.bf16.mxu1 %v793_v59  ;;  %v2171_v14 = vpop.f32.mrf.mxu0  ;;  %v2173_v15 = vpop.f32.mrf.mxu1 }
 0x105   :  { %1049 = vmatprep.mubr.bf16.mxu0 %v1828_v5  ;;  %1122 = vmatprep.mubr.bf16.mxu1 %v1828_v5  ;;  %v637_v8 = vadd.f32 %v2171_v14, %v2053_v42  ;;  %v690_v9 = vadd.f32 %v2173_v15, %v2053_v42  ;;  %v686_v14 = vadd.f32 %v2153_v57, %v2049_v34  ;;  %v732_v25 = vmax.f32 %v688_v16, 0.0 }
 0x106   :  { %v640_v22 = vpop.f32.mrf.mxu0  ;;  %v693_v23 = vpop.f32.mrf.mxu1  ;;  %v635_v15 = vadd.f32 %v2158_v1, %v2053_v42 }
 0x107   :  { %v641_v10 = vadd.f32 %v640_v22, %v2047_v33  ;;  %v694_v13 = vadd.f32 %v693_v23, %v2047_v33  ;;  %v731_v18 = vmax.f32 %v637_v8, 0.0  ;;  %v717_v57 = vmax.f32 %v686_v14, 0.0 }
 0x108   :  { %v642_v28 = vpop.f32.mrf.mxu0  ;;  %v695_v7 = vpop.f32.mrf.mxu1  ;;  %v730_v24 = vmax.f32 %v635_v15, 0.0  ;;  %v780_v50 = vpack.c.bf16 %v732_v25, %v716_v6 }
 0x109   :  { %v643_v60 = vadd.f32 %v642_v28, %v2047_v33  ;;  %v696_v40 = vadd.f32 %v695_v7, %v2047_v33  ;;  %v733_v33 = vmax.f32 %v690_v9, 0.0  ;;  %v748_v22 = vmax.f32 %v694_v13, 0.0 }
 0x10a   :  { %v644_v37 = vpop.f32.mrf.mxu0  ;;  %v697_v38 = vpop.f32.mrf.mxu1 }
 0x10b   :  { %1777 = vmatmul.mubr.msk.bf16.vlgmr.msra.gmra.mxu0 %vm858_vm3, %v2078_v36  ;;  %1781 = vmatmul.mubr.msk.bf16.vlgmr.msra.gmra.mxu1 %vm858_vm3, %v2078_v36  ;;  %v747_v52 = vmax.f32 %v643_v60, 0.0  ;;  %v749_v53 = vmax.f32 %v696_v40, 0.0  ;;  %v645_v63 = vadd.f32 %v644_v37, %v2051_v41  ;;  %v698_v0 = vadd.f32 %v697_v38, %v2051_v41 }
 0x10c   :  { %1176 = vmatpush1.bf16.msra.mxu0 %v790_v32  ;;  %1249 = vmatpush1.bf16.msra.mxu1 %v792_v35  ;;  %v646_v44 = vpop.f32.mrf.mxu0  ;;  %v699_v45 = vpop.f32.mrf.mxu1  ;;  %v781_v42 = vpack.c.bf16 %v733_v33, %v717_v57 }
 0x10d   :  { %v647_v46 = vadd.f32 %v646_v44, %v2051_v41  ;;  %v700_v47 = vadd.f32 %v699_v45, %v2051_v41  ;;  %1177 = vmatprep.subr.bf16.mxu0 %v775_v31  ;;  %1250 = vmatprep.subr.bf16.mxu1 %v777_v39  ;;  %v633_v41 = vadd.f32 %v2151_v56, %v2049_v34  ;;  %v762_v17 = vmax.f32 %v645_v63, 0.0 }
 0x10e   :  { %1059 = vmatprep.mubr.bf16.mxu0 %v1828_v5  ;;  %1132 = vmatprep.mubr.bf16.mxu1 %v1828_v5  ;;  %v764_v11 = vmax.f32 %v698_v0, 0.0  ;;  %v746_v56 = vmax.f32 %v641_v10, 0.0  ;;  %v778_v34 = vpack.c.bf16 %v730_v24, %v714_v49 }
 0x10f   :  { %v763_v54 = vmax.f32 %v647_v46, 0.0  ;;  %v765_v58 = vmax.f32 %v700_v47, 0.0  ;;  %v715_v23 = vmax.f32 %v633_v41, 0.0 }
 0x110   :  { %1178 = vmatpush1.bf16.msra.mxu0 %v774_v48  ;;  %1251 = vmatpush1.bf16.msra.mxu1 %v776_v51  ;;  %v794_v1 = vpack.c.bf16 %v762_v17, %v746_v56  ;;  %v796_v12 = vpack.c.bf16 %v764_v11, %v748_v22 }
 0x111   :  { %v795_v59 = vpack.c.bf16 %v763_v54, %v747_v52  ;;  %v797_v62 = vpack.c.bf16 %v765_v58, %v749_v53  ;;  %v779_v20 = vpack.c.bf16 %v731_v18, %v715_v23 }
 0x113   :  { %1778 = vmatmul.mubr.msk.bf16.gmra.mxu0 %vm858_vm3, %v2106_v4  ;;  %1782 = vmatmul.mubr.msk.bf16.gmra.mxu1 %vm858_vm3, %v2106_v4 }
 0x114   :  { %1321 = vmatprep.subr.bf16.mxu0 %v795_v59  ;;  %1394 = vmatprep.subr.bf16.mxu1 %v797_v62  ;;  %v2296_v59 = vpop.permute.xlu1 %815 }
 0x115   :  { %1069 = vmatprep.mubr.bf16.mxu0 %v1828_v5  ;;  %1142 = vmatprep.mubr.bf16.mxu1 %v1828_v5 }
 0x11b   :  { %1779 = vmatmul.mubr.msk.bf16.gmra.mxu0 %vm858_vm3, %v2130_v26  ;;  %1783 = vmatmul.mubr.msk.bf16.gmra.mxu1 %vm858_vm3, %v2130_v26 }
 0x11c   :  { %1079 = vmatprep.mubr.bf16.mxu0 %v1828_v5  ;;  %1152 = vmatprep.mubr.bf16.mxu1 %v1828_v5 }
 0x123   :  { %1780 = vmatmul.mubr.msk.bf16.gmra.mxu0 %vm858_vm3, %v2149_v55  ;;  %1784 = vmatmul.mubr.msk.bf16.gmra.mxu1 %vm858_vm3, %v2149_v55 }
 0x124   :  { %1195 = vmatprep.mubr.bf16.mxu0 %v1828_v5  ;;  %1268 = vmatprep.mubr.bf16.mxu1 %v1828_v5 }
 0x12b   :  { %1785 = vmatmul.mubr.msk.bf16.vlgmr.msra.gmra.mxu0 %vm858_vm3, %v2078_v36  ;;  %1789 = vmatmul.mubr.msk.bf16.vlgmr.msra.gmra.mxu1 %vm858_vm3, %v2078_v36 }
 0x12c   :  { %1322 = vmatpush1.bf16.msra.mxu0 %v794_v1  ;;  %1395 = vmatpush1.bf16.msra.mxu1 %v796_v12 }
 0x12d   :  { %1323 = vmatprep.subr.bf16.mxu0 %v779_v20  ;;  %1396 = vmatprep.subr.bf16.mxu1 %v781_v42 }
 0x12e   :  { %1205 = vmatprep.mubr.bf16.mxu0 %v1828_v5  ;;  %1278 = vmatprep.mubr.bf16.mxu1 %v1828_v5 }
 0x130   :  { %1324 = vmatpush1.bf16.msra.mxu0 %v778_v34  ;;  %1397 = vmatpush1.bf16.msra.mxu1 %v780_v50 }
 0x133   :  { %1786 = vmatmul.mubr.msk.bf16.gmra.mxu0 %vm858_vm3, %v2106_v4  ;;  %1790 = vmatmul.mubr.msk.bf16.gmra.mxu1 %vm858_vm3, %v2106_v4 }
 0x134   :  { %1215 = vmatprep.mubr.bf16.mxu0 %v1828_v5  ;;  %1288 = vmatprep.mubr.bf16.mxu1 %v1828_v5 }
 0x13b   :  { %1787 = vmatmul.mubr.msk.bf16.gmra.mxu0 %vm858_vm3, %v2130_v26  ;;  %1791 = vmatmul.mubr.msk.bf16.gmra.mxu1 %vm858_vm3, %v2130_v26 }
 0x13c   :  { %1225 = vmatprep.mubr.bf16.mxu0 %v1828_v5  ;;  %1298 = vmatprep.mubr.bf16.mxu1 %v1828_v5 }
 0x143   :  { %1788 = vmatmul.mubr.msk.bf16.gmra.mxu0 %vm858_vm3, %v2149_v55  ;;  %1792 = vmatmul.mubr.msk.bf16.gmra.mxu1 %vm858_vm3, %v2149_v55 }
 0x144   :  { %1341 = vmatprep.mubr.bf16.mxu0 %v1828_v5  ;;  %1414 = vmatprep.mubr.bf16.mxu1 %v1828_v5 }
 0x14b   :  { %1793 = vmatmul.mubr.msk.bf16.vlgmr.msra.gmra.mxu0 %vm858_vm3, %v2078_v36  ;;  %1797 = vmatmul.mubr.msk.bf16.vlgmr.msra.gmra.mxu1 %vm858_vm3, %v2078_v36  ;;  %v2281_v36 = vpop.permute.xlu0 %800 }
 0x14c   :  { %1351 = vmatprep.mubr.bf16.mxu0 %v1828_v5  ;;  %1424 = vmatprep.mubr.bf16.mxu1 %v1828_v5 }
 0x14f   :  { %v2292_v46 = vpop.permute.xlu0 %810 }
 0x153   :  { %1794 = vmatmul.mubr.msk.bf16.gmra.mxu0 %vm858_vm3, %v2106_v4  ;;  %1798 = vmatmul.mubr.msk.bf16.gmra.mxu1 %vm858_vm3, %v2106_v4  ;;  %v2304_v19 = vpop.permute.xlu0 %820 }
 0x154   :  { %1361 = vmatprep.mubr.bf16.mxu0 %v1828_v5  ;;  %1434 = vmatprep.mubr.bf16.mxu1 %v1828_v5 }
 0x15b   :  { %1795 = vmatmul.mubr.msk.bf16.gmra.mxu0 %vm858_vm3, %v2130_v26  ;;  %1799 = vmatmul.mubr.msk.bf16.gmra.mxu1 %vm858_vm3, %v2130_v26 }
 0x15c   :  { %1371 = vmatprep.mubr.bf16.mxu0 %v1828_v5  ;;  %1444 = vmatprep.mubr.bf16.mxu1 %v1828_v5 }
 0x163   :  { %1796 = vmatmul.mubr.msk.bf16.gmra.mxu0 %vm858_vm3, %v2149_v55  ;;  %1800 = vmatmul.mubr.msk.bf16.gmra.mxu1 %vm858_vm3, %v2149_v55 }
 0x1ab   :  { %v905_v4 = vpop.f32.mrf.mxu0  ;;  %v978_v27 = vpop.f32.mrf.mxu1 }
 0x1ac   :  { %v906_v3 = vadd.f32 %v905_v4, %v2281_v36  ;;  %v979_v26 = vadd.f32 %v978_v27, %v2281_v36 }
 0x1ad   :  { %v907_v28 = vpop.f32.mrf.mxu0  ;;  %v980_v7 = vpop.f32.mrf.mxu1 }
 0x1ae   :  { %v908_v5 = vadd.f32 %v907_v28, %v2281_v36  ;;  %v981_v30 = vadd.f32 %v980_v7, %v2281_v36  ;;  %v1455_v32 = vmax.f32 %v906_v3, 0.0  ;;  %v1457_v39 = vmax.f32 %v979_v26, 0.0 }
 0x1af   :  { %v909_v2 = vpop.f32.mrf.mxu0  ;;  %v982_v31 = vpop.f32.mrf.mxu1 }
 0x1b0   :  { %v1456_v55 = vmax.f32 %v908_v5, 0.0  ;;  %v910_v35 = vadd.f32 %v909_v2, %v2284_v29  ;;  %v983_v40 = vadd.f32 %v982_v31, %v2284_v29  ;;  %v1458_v43 = vmax.f32 %v981_v30, 0.0  ;;  %v2316_v2 = vpop.permute.xlu1 %825 }
 0x1b1   :  { %v911_v37 = vpop.f32.mrf.mxu0  ;;  %v984_v38 = vpop.f32.mrf.mxu1 }
 0x1b2   :  { %v1583_v60 = vmax.f32 %v1455_v32, %v1456_v55  ;;  %v912_v61 = vadd.f32 %v911_v37, %v2284_v29  ;;  %v1471_v48 = vmax.f32 %v910_v35, 0.0  ;;  %v985_v52 = vadd.f32 %v984_v38, %v2284_v29 }
 0x1b3   :  { %v915_v44 = vpop.f32.mrf.mxu0  ;;  %v988_v45 = vpop.f32.mrf.mxu1  ;;  %v1473_v63 = vmax.f32 %v983_v40, 0.0 }
 0x1b4   :  { %v1591_v47 = vmax.f32 %v1583_v60, %v1457_v39  ;;  %v1472_v51 = vmax.f32 %v912_v61, 0.0  ;;  %v916_v53 = vadd.f32 %v915_v44, %v2292_v46  ;;  %v989_v8 = vadd.f32 %v988_v45, %v2292_v46  ;;  %v2320_v60 = vpop.permute.xlu0 %830 }
 0x1b5   :  { %v917_v54 = vpop.f32.mrf.mxu0  ;;  %v990_v58 = vpop.f32.mrf.mxu1  ;;  %v1474_v41 = vmax.f32 %v985_v52, 0.0 }
 0x1b6   :  { %v2298_v62 = vmax.f32 %v1591_v47, %v1458_v43  ;;  %v1584_v0 = vmax.f32 %v1471_v48, %v1472_v51  ;;  %v918_v9 = vadd.f32 %v917_v54, %v2292_v46  ;;  %v1487_v16 = vmax.f32 %v916_v53, 0.0 }
 0x1b7   :  { %v919_v10 = vpop.f32.mrf.mxu0  ;;  %v992_v13 = vpop.f32.mrf.mxu1  ;;  %v991_v11 = vadd.f32 %v990_v58, %v2292_v46  ;;  %v1489_v23 = vmax.f32 %v989_v8, 0.0 }
 0x1b8   :  { %v1592_v14 = vmax.f32 %v1584_v0, %v1473_v63  ;;  %v920_v15 = vadd.f32 %v919_v10, %v2296_v59  ;;  %v1488_v17 = vmax.f32 %v918_v9, 0.0  ;;  %v993_v56 = vadd.f32 %v992_v13, %v2296_v59  ;;  %v2328_v9 = vpop.permute.xlu1 %835 }
 0x1b9   :  { %v921_v18 = vpop.f32.mrf.mxu0  ;;  %v994_v33 = vpop.f32.mrf.mxu1  ;;  %v1490_v49 = vmax.f32 %v991_v11, 0.0 }
 0x1ba   :  { %v2306_v21 = vmax.f32 %v1592_v14, %v1474_v41  ;;  %v922_v22 = vadd.f32 %v921_v18, %v2296_v59  ;;  %v1585_v57 = vmax.f32 %v1487_v16, %v1488_v17  ;;  %v995_v24 = vadd.f32 %v994_v33, %v2296_v59 }
 0x1bb   :  { %v925_v25 = vpop.f32.mrf.mxu0  ;;  %v998_v1 = vpop.f32.mrf.mxu1  ;;  %v1503_v12 = vmax.f32 %v920_v15, 0.0  ;;  %v1505_v4 = vmax.f32 %v993_v56, 0.0 }
 0x1bc   :  { %v1504_v20 = vmax.f32 %v922_v22, 0.0  ;;  %v926_v42 = vadd.f32 %v925_v25, %v2304_v19  ;;  %v1593_v6 = vmax.f32 %v1585_v57, %v1489_v23  ;;  %v999_v3 = vadd.f32 %v998_v1, %v2304_v19 }
 0x1bd   :  { %v927_v34 = vpop.f32.mrf.mxu0  ;;  %v1000_v50 = vpop.f32.mrf.mxu1  ;;  %v1506_v26 = vmax.f32 %v995_v24, 0.0 }
 0x1be   :  { %v1586_v27 = vmax.f32 %v1503_v12, %v1504_v20  ;;  %v928_v28 = vadd.f32 %v927_v34, %v2304_v19  ;;  %v2314_v7 = vmax.f32 %v1593_v6, %v1490_v49  ;;  %v1519_v32 = vmax.f32 %v926_v42, 0.0 }
 0x1bf   :  { %v929_v5 = vpop.f32.mrf.mxu0  ;;  %v1002_v30 = vpop.f32.mrf.mxu1  ;;  %v1001_v35 = vadd.f32 %v1000_v50, %v2304_v19  ;;  %v1521_v61 = vmax.f32 %v999_v3, 0.0 }
 0x1c0   :  { %v1594_v31 = vmax.f32 %v1586_v27, %v1505_v4  ;;  %v1520_v55 = vmax.f32 %v928_v28, 0.0  ;;  %v930_v37 = vadd.f32 %v929_v5, %v2316_v2  ;;  %v1003_v44 = vadd.f32 %v1002_v30, %v2316_v2 }
 0x1c1   :  { %v931_v38 = vpop.f32.mrf.mxu0  ;;  %v1004_v39 = vpop.f32.mrf.mxu1  ;;  %v1522_v51 = vmax.f32 %v1001_v35, 0.0 }
 0x1c2   :  { %v2322_v40 = vmax.f32 %v1594_v31, %v1506_v26  ;;  %v1587_v43 = vmax.f32 %v1519_v32, %v1520_v55  ;;  %v932_v45 = vadd.f32 %v931_v38, %v2316_v2  ;;  %v1535_v54 = vmax.f32 %v930_v37, 0.0 }
 0x1c3   :  { %v935_v47 = vpop.f32.mrf.mxu0  ;;  %v1008_v48 = vpop.f32.mrf.mxu1  ;;  %v1005_v63 = vadd.f32 %v1004_v39, %v2316_v2  ;;  %v1537_v14 = vmax.f32 %v1003_v44, 0.0 }
 0x1c4   :  { %v1595_v52 = vmax.f32 %v1587_v43, %v1521_v61  ;;  %v936_v53 = vadd.f32 %v935_v47, %v2320_v60  ;;  %v1536_v58 = vmax.f32 %v932_v45, 0.0  ;;  %v1009_v13 = vadd.f32 %v1008_v48, %v2320_v60 }
 0x1c5   :  { %v937_v0 = vpop.f32.mrf.mxu0  ;;  %v1010_v8 = vpop.f32.mrf.mxu1  ;;  %v1538_v22 = vmax.f32 %v1005_v63, 0.0 }
 0x1c6   :  { %v2330_v10 = vmax.f32 %v1595_v52, %v1522_v51  ;;  %v938_v41 = vadd.f32 %v937_v0, %v2320_v60  ;;  %v1588_v15 = vmax.f32 %v1535_v54, %v1536_v58  ;;  %v1011_v16 = vadd.f32 %v1010_v8, %v2320_v60 }
 0x1c7   :  { %v939_v17 = vpop.f32.mrf.mxu0  ;;  %v1012_v11 = vpop.f32.mrf.mxu1  ;;  %v1551_v18 = vmax.f32 %v936_v53, 0.0  ;;  %v1553_v25 = vmax.f32 %v1009_v13, 0.0 }
 0x1c8   :  { %v1552_v33 = vmax.f32 %v938_v41, 0.0  ;;  %v940_v56 = vadd.f32 %v939_v17, %v2328_v9  ;;  %v1596_v23 = vmax.f32 %v1588_v15, %v1537_v14  ;;  %v1013_v12 = vadd.f32 %v1012_v11, %v2328_v9 }
 0x1c9   :  { %v941_v57 = vpop.f32.mrf.mxu0  ;;  %v1014_v24 = vpop.f32.mrf.mxu1  ;;  %v1554_v49 = vmax.f32 %v1011_v16, 0.0 }
 0x1ca   :  { %v1589_v1 = vmax.f32 %v1551_v18, %v1552_v33  ;;  %v942_v20 = vadd.f32 %v941_v57, %v2328_v9  ;;  %v2338_v42 = vmax.f32 %v1596_v23, %v1538_v22  ;;  %v1567_v4 = vmax.f32 %v940_v56, 0.0 }
 0x1cb   :  { %v1051_v6 = vpop.f32.mrf.mxu0  ;;  %v1124_v34 = vpop.f32.mrf.mxu1  ;;  %v1015_v3 = vadd.f32 %v1014_v24, %v2328_v9  ;;  %v1569_v30 = vmax.f32 %v1013_v12, 0.0 }
 0x1cc   :  { %v1597_v50 = vmax.f32 %v1589_v1, %v1553_v25  ;;  %v1568_v27 = vmax.f32 %v942_v20, 0.0  ;;  %v1052_v8 = vadd.f32 %v1051_v6, %v2281_v36  ;;  %v1125_v12 = vadd.f32 %v1124_v34, %v2281_v36 }
 0x1cd   :  { %v1053_v28 = vpop.f32.mrf.mxu0  ;;  %v1126_v26 = vpop.f32.mrf.mxu1  ;;  %v1570_v35 = vmax.f32 %v1015_v3, 0.0 }
 0x1ce   :  { %v2341_v5 = vmax.f32 %v1597_v50, %v1554_v49  ;;  %v1590_v31 = vmax.f32 %v1567_v4, %v1568_v27  ;;  %v1459_v17 = vmax.f32 %v1052_v8, 0.0  ;;  %v1054_v11 = vadd.f32 %v1053_v28, %v2281_v36 }
 0x1cf   :  { %v1055_v32 = vpop.f32.mrf.mxu0  ;;  %v1128_v55 = vpop.f32.mrf.mxu1 }
 0x1d0   :  { %v1598_v37 = vmax.f32 %v1590_v31, %v1569_v30  ;;  %v1056_v13 = vadd.f32 %v1055_v32, %v2284_v29  ;;  %v1607_v1 = vmax.f32 %v2298_v62, %v1459_v17  ;;  %v1460_v20 = vmax.f32 %v1054_v11, 0.0 }
 0x1d1   :  { %v1057_v38 = vpop.f32.mrf.mxu0  ;;  %v1130_v39 = vpop.f32.mrf.mxu1  ;;  %v1129_v34 = vadd.f32 %v1128_v55, %v2284_v29 }
 0x1d2   :  { %v2343_v61 = vmax.f32 %v1598_v37, %v1570_v35  ;;  %v1475_v18 = vmax.f32 %v1056_v13, 0.0  ;;  %v1058_v33 = vadd.f32 %v1057_v38, %v2284_v29  ;;  %v1615_v37 = vmax.f32 %v1607_v1, %v1460_v20 }
 0x1d3   :  { %v1061_v43 = vpop.f32.mrf.mxu0  ;;  %v1134_v44 = vpop.f32.mrf.mxu1 }
 0x1d4   :  { %v1062_v56 = vadd.f32 %v1061_v43, %v2292_v46  ;;  %v1608_v6 = vmax.f32 %v2306_v21, %v1475_v18  ;;  %v1476_v50 = vmax.f32 %v1058_v33, 0.0  ;;  %v1461_v21 = vmax.f32 %v1125_v12, 0.0 }
 0x1d5   :  { %v1063_v45 = vpop.f32.mrf.mxu0  ;;  %v2345_v47 = vpop.f32.mrf.mxu1  ;;  %v1477_v18 = vmax.f32 %v1129_v34, 0.0  ;;  %v1131_v33 = vadd.f32 %v1130_v39, %v2284_v29 }
 0x1d6   :  { %v1491_v4 = vmax.f32 %v1062_v56, 0.0  ;;  %v1064_v27 = vadd.f32 %v1063_v45, %v2292_v46  ;;  %v1127_v45 = vadd.f32 %v1126_v26, %v2281_v36 }
 0x1d7   :  { %v1065_v48 = vpop.f32.mrf.mxu0  ;;  %v1138_v51 = vpop.f32.mrf.mxu1 }
 0x1d8   :  { %v1066_v57 = vadd.f32 %v1065_v48, %v2296_v59  ;;  %v1616_v48 = vmax.f32 %v1608_v6, %v1476_v50  ;;  %v1492_v8 = vmax.f32 %v1064_v27, 0.0 }
 0x1d9   :  { %v1067_v52 = vpop.f32.mrf.mxu0  ;;  %v2347_v53 = vpop.f32.mrf.mxu1 }
 0x1da   :  { %v1507_v30 = vmax.f32 %v1066_v57, 0.0  ;;  %v1068_v31 = vadd.f32 %v1067_v52, %v2296_v59  ;;  %v1139_v57 = vadd.f32 %v1138_v51, %v2296_v59  ;;  %v1624_v20 = vmax.f32 %v1616_v48, %v1477_v18 }
 0x1db   :  { %v1071_v54 = vpop.f32.mrf.mxu0  ;;  %v2349_v58 = vpop.f32.mrf.mxu1  ;;  %v1478_v51 = vmax.f32 %v1131_v33, 0.0 }
 0x1dc   :  { %v1072_v49 = vadd.f32 %v1071_v54, %v2304_v19  ;;  %v1609_v54 = vmax.f32 %v2314_v7, %v1491_v4  ;;  %v1610_v55 = vmax.f32 %v2322_v40, %v1507_v30  ;;  %v1623_v7 = vmax.f32 %v1615_v37, %v1461_v21 }
 0x1dd   :  { %v1073_v63 = vpop.f32.mrf.mxu0  ;;  %v2351_v0 = vpop.f32.mrf.mxu1  ;;  %v1462_v40 = vmax.f32 %v1127_v45, 0.0  ;;  %v1145_v50 = vadd.f32 %v2349_v58, %v2304_v19  ;;  %v1509_v21 = vmax.f32 %v1139_v57, 0.0 }
 0x1de   :  { %v1523_v38 = vmax.f32 %v1072_v49, 0.0  ;;  %v1074_v43 = vadd.f32 %v1073_v63, %v2304_v19  ;;  %v1135_v63 = vadd.f32 %v1134_v44, %v2292_v46  ;;  %v1617_v49 = vmax.f32 %v1609_v54, %v1492_v8 }
 0x1df   :  { %v1075_v41 = vpop.f32.mrf.mxu0  ;;  %v2355_v14 = vpop.f32.mrf.mxu1  ;;  %v1147_v45 = vadd.f32 %v2351_v0, %v2304_v19  ;;  %v1525_v54 = vmax.f32 %v1145_v50, 0.0 }
 0x1e0   :  { %v1076_v62 = vadd.f32 %v1075_v41, %v2316_v2  ;;  %v1508_v41 = vmax.f32 %v1068_v31, 0.0  ;;  %v1611_v1 = vmax.f32 %v2330_v10, %v1523_v38  ;;  %v1524_v12 = vmax.f32 %v1074_v43, 0.0 }
 0x1e1   :  { %v1077_v15 = vpop.f32.mrf.mxu0  ;;  %v2357_v16 = vpop.f32.mrf.mxu1  ;;  %v1493_v30 = vmax.f32 %v1135_v63, 0.0  ;;  %v1141_v10 = vadd.f32 %v2347_v53, %v2296_v59  ;;  %v1149_v58 = vadd.f32 %v2355_v14, %v2316_v2  ;;  %v1632_v38 = vmax.f32 %v1624_v20, %v1478_v51 }
 0x1e2   :  { %v1539_v17 = vmax.f32 %v1076_v62, 0.0  ;;  %v1078_v11 = vadd.f32 %v1077_v15, %v2316_v2  ;;  %v1137_v15 = vadd.f32 %v2345_v47, %v2292_v46  ;;  %v1618_v44 = vmax.f32 %v1610_v55, %v1508_v41 }
 0x1e3   :  { %v1081_v22 = vpop.f32.mrf.mxu0  ;;  %v2362_v23 = vpop.f32.mrf.mxu1  ;;  %v2412_v47 = vmax.f32 %v1623_v7, %v1462_v40  ;;  %v1619_v37 = vmax.f32 %v1611_v1, %v1524_v12  ;;  %v1625_v43 = vmax.f32 %v1617_v49, %v1493_v30  ;;  %v1151_v55 = vadd.f32 %v2357_v16, %v2316_v2 }
 0x1e4   :  { %v1612_v4 = vmax.f32 %v2338_v42, %v1539_v17  ;;  %v1540_v27 = vmax.f32 %v1078_v11, 0.0  ;;  %v1082_v31 = vadd.f32 %v1081_v22, %v2320_v60  ;;  %v1494_v42 = vmax.f32 %v1137_v15, 0.0 }
 0x1e5   :  { %v2365_v24 = vpop.f32.mrf.mxu0  ;;  %v2367_v25 = vpop.f32.mrf.mxu1  ;;  %v1626_v22 = vmax.f32 %v1618_v44, %v1509_v21  ;;  %v1510_v41 = vmax.f32 %v1141_v10, 0.0  ;;  %v1627_v0 = vmax.f32 %v1619_v37, %v1525_v54  ;;  %v1541_v63 = vmax.f32 %v1149_v58, 0.0 }
 0x1e6   :  { %v1620_v8 = vmax.f32 %v1612_v4, %v1540_v27  ;;  %v1555_v17 = vmax.f32 %v1082_v31, 0.0  ;;  %v1084_v14 = vadd.f32 %v2365_v24, %v2320_v60  ;;  %v1155_v7 = vadd.f32 %v2362_v23, %v2320_v60 }
 0x1e7   :  { %v2374_v3 = vpop.f32.mrf.mxu0  ;;  %v2376_v28 = vpop.f32.mrf.mxu1  ;;  %v2432_v57 = vadd.f32 %v2367_v25, %v2320_v60  ;;  %v1633_v16 = vmax.f32 %v1625_v43, %v1494_v42  ;;  %v1526_v1 = vmax.f32 %v1147_v45, 0.0  ;;  %v1634_v20 = vmax.f32 %v1626_v22, %v1510_v41 }
 0x1e8   :  { %v1086_v11 = vadd.f32 %v2374_v3, %v2328_v9  ;;  %v1542_v49 = vmax.f32 %v1151_v55, 0.0  ;;  %v1628_v15 = vmax.f32 %v1620_v8, %v1541_v63  ;;  %v1613_v50 = vmax.f32 %v2341_v5, %v1555_v17 }
 0x1e9   :  { %v2381_v32 = vpop.f32.mrf.mxu0  ;;  %v2383_v35 = vpop.f32.mrf.mxu1  ;;  %v1556_v23 = vmax.f32 %v1084_v14, 0.0  ;;  %v1557_v30 = vmax.f32 %v1155_v7, 0.0 }
 0x1ea   :  { %v1571_v4 = vmax.f32 %v1086_v11, 0.0  ;;  %v1088_v25 = vadd.f32 %v2381_v32, %v2328_v9  ;;  %v1159_v32 = vadd.f32 %v2376_v28, %v2328_v9  ;;  %v2451_v22 = vmax.f32 %v1628_v15, %v1542_v49 }
 0x1eb   :  { %v1197_v52 = vpop.f32.mrf.mxu0  ;;  %v2388_v13 = vpop.f32.mrf.mxu1  ;;  %v1621_v54 = vmax.f32 %v1613_v50, %v1556_v23 }
 0x1ec   :  { %v1198_v12 = vadd.f32 %v1197_v52, %v2281_v36  ;;  %v1635_v52 = vmax.f32 %v1627_v0, %v1526_v1  ;;  %v1614_v8 = vmax.f32 %v2343_v61, %v1571_v4  ;;  %v1572_v55 = vmax.f32 %v1088_v25, 0.0 }
 0x1ed   :  { %v2394_v56 = vpop.f32.mrf.mxu0  ;;  %v2396_v26 = vpop.f32.mrf.mxu1  ;;  %v1271_v17 = vadd.f32 %v2388_v13, %v2281_v36 }
 0x1ee   :  { %v1463_v31 = vmax.f32 %v1198_v12, 0.0  ;;  %v1200_v21 = vadd.f32 %v2394_v56, %v2281_v36  ;;  %v1622_v49 = vmax.f32 %v1614_v8, %v1572_v55  ;;  %v1273_v25 = vadd.f32 %v2396_v26, %v2281_v36 }
 0x1ef   :  { %v1201_v6 = vpop.f32.mrf.mxu0  ;;  %v2402_v39 = vpop.f32.mrf.mxu1  ;;  %v1465_v4 = vmax.f32 %v1271_v17, 0.0 }
 0x1f0   :  { %v1202_v24 = vadd.f32 %v1201_v6, %v2284_v29  ;;  %v1558_v6 = vmax.f32 %v2432_v57, 0.0  ;;  %v1639_v11 = vmax.f32 %v2412_v47, %v1463_v31  ;;  %v1275_v13 = vadd.f32 %v2402_v39, %v2284_v29 }
 0x1f1   :  { %v1203_v62 = vpop.f32.mrf.mxu0  ;;  %v2410_v34 = vpop.f32.mrf.mxu1 }
 0x1f2   :  { %v1479_v37 = vmax.f32 %v1202_v24, 0.0  ;;  %v1204_v5 = vadd.f32 %v1203_v62, %v2284_v29  ;;  %v1161_v62 = vadd.f32 %v2383_v35, %v2328_v9  ;;  %v1573_v35 = vmax.f32 %v1159_v32, 0.0 }
 0x1f3   :  { %v1207_v48 = vpop.f32.mrf.mxu0  ;;  %v2418_v53 = vpop.f32.mrf.mxu1 }
 0x1f4   :  { %v1208_v44 = vadd.f32 %v1207_v48, %v2292_v46  ;;  %v1640_v0 = vmax.f32 %v1632_v38, %v1479_v37  ;;  %v1480_v63 = vmax.f32 %v1204_v5, 0.0  ;;  %v1574_v50 = vmax.f32 %v1161_v62, 0.0 }
 0x1f5   :  { %v1209_v18 = vpop.f32.mrf.mxu0  ;;  %v2426_v33 = vpop.f32.mrf.mxu1  ;;  %v1281_v47 = vadd.f32 %v2418_v53, %v2292_v46  ;;  %v1630_v5 = vmax.f32 %v1622_v49, %v1573_v35  ;;  %v1277_v53 = vadd.f32 %v2410_v34, %v2284_v29 }
 0x1f6   :  { %v1495_v43 = vmax.f32 %v1208_v44, 0.0  ;;  %v1210_v45 = vadd.f32 %v1209_v18, %v2292_v46  ;;  %v1464_v18 = vmax.f32 %v1200_v21, 0.0  ;;  %v1283_v26 = vadd.f32 %v2426_v33, %v2292_v46 }
 0x1f7   :  { %v1211_v40 = vpop.f32.mrf.mxu0  ;;  %v1284_v3 = vpop.f32.mrf.mxu1 }
 0x1f8   :  { %v1212_v10 = vadd.f32 %v1211_v40, %v2296_v59  ;;  %v1641_v61 = vmax.f32 %v1633_v16, %v1495_v43  ;;  %v1496_v1 = vmax.f32 %v1210_v45, 0.0  ;;  %v1629_v40 = vmax.f32 %v1621_v54, %v1557_v30 }
 0x1f9   :  { %v1213_v27 = vpop.f32.mrf.mxu0  ;;  %v2440_v51 = vpop.f32.mrf.mxu1  ;;  %v1647_v16 = vmax.f32 %v1639_v11, %v1464_v18  ;;  %v1285_v21 = vadd.f32 %v1284_v3, %v2296_v59  ;;  %v1497_v45 = vmax.f32 %v1281_v47, 0.0  ;;  %v1482_v11 = vmax.f32 %v1277_v53, 0.0 }
 0x1fa   :  { %v1511_v28 = vmax.f32 %v1212_v10, 0.0  ;;  %v1214_v14 = vadd.f32 %v1213_v27, %v2296_v59  ;;  %v1648_v27 = vmax.f32 %v1640_v0, %v1480_v63  ;;  %v1649_v31 = vmax.f32 %v1641_v61, %v1496_v1 }
 0x1fb   :  { %v1217_v58 = vpop.f32.mrf.mxu0  ;;  %v1290_v42 = vpop.f32.mrf.mxu1  ;;  %v2476_v3 = vmax.f32 %v1629_v40, %v1558_v6  ;;  %v1655_v8 = vmax.f32 %v1647_v16, %v1465_v4  ;;  %v1513_v17 = vmax.f32 %v1285_v21, 0.0  ;;  %v2490_v63 = vmax.f32 %v1630_v5, %v1574_v50 }
 0x1fc   :  { %v1218_v48 = vadd.f32 %v1217_v58, %v2304_v19  ;;  %v1642_v38 = vmax.f32 %v1634_v20, %v1511_v28  ;;  %v1512_v23 = vmax.f32 %v1214_v14, 0.0  ;;  %v1481_v58 = vmax.f32 %v1275_v13, 0.0 }
 0x1fd   :  { %v1219_v56 = vpop.f32.mrf.mxu0  ;;  %v1292_v41 = vpop.f32.mrf.mxu1  ;;  %v1291_v54 = vadd.f32 %v1290_v42, %v2304_v19  ;;  %v1657_v62 = vmax.f32 %v1649_v31, %v1497_v45  ;;  %v1287_v28 = vadd.f32 %v2440_v51, %v2296_v59 }
 0x1fe   :  { %v1527_v12 = vmax.f32 %v1218_v48, 0.0  ;;  %v1220_v24 = vadd.f32 %v1219_v56, %v2304_v19  ;;  %v1650_v48 = vmax.f32 %v1642_v38, %v1512_v23  ;;  %v1656_v55 = vmax.f32 %v1648_v27, %v1481_v58 }
 0x1ff   :  { %v1221_v7 = vpop.f32.mrf.mxu0  ;;  %v1294_v57 = vpop.f32.mrf.mxu1  ;;  %v1293_v33 = vadd.f32 %v1292_v41, %v2304_v19  ;;  %v1529_v1 = vmax.f32 %v1291_v54, 0.0  ;;  %v1514_v13 = vmax.f32 %v1287_v28, 0.0 }
 0x200   :  { %v1643_v39 = vmax.f32 %v1635_v52, %v1527_v12  ;;  %v1528_v37 = vmax.f32 %v1220_v24, 0.0  ;;  %v1222_v20 = vadd.f32 %v1221_v7, %v2316_v2  ;;  %v1466_v52 = vmax.f32 %v1273_v25, 0.0 }
 0x201   :  { %v1223_v15 = vpop.f32.mrf.mxu0  ;;  %v1296_v44 = vpop.f32.mrf.mxu1  ;;  %v1498_v7 = vmax.f32 %v1283_v26, 0.0  ;;  %v1658_v61 = vmax.f32 %v1650_v48, %v1513_v17  ;;  %v1664_v24 = vmax.f32 %v1656_v55, %v1482_v11  ;;  %v1295_v51 = vadd.f32 %v1294_v57, %v2316_v2 }
 0x202   :  { %v1651_v14 = vmax.f32 %v1643_v39, %v1528_v37  ;;  %v1543_v18 = vmax.f32 %v1222_v20, 0.0  ;;  %v1224_v6 = vadd.f32 %v1223_v15, %v2316_v2  ;;  %v1663_v12 = vmax.f32 %v1655_v8, %v1466_v52 }
 0x203   :  { %v1227_v30 = vpop.f32.mrf.mxu0  ;;  %v1300_v10 = vpop.f32.mrf.mxu1  ;;  %v2494_v40 = vadd.f32 %v1296_v44, %v2316_v2  ;;  %v2496_v49 = vmax.f32 %v1657_v62, %v1498_v7  ;;  %v1530_v50 = vmax.f32 %v1293_v33, 0.0  ;;  %v2501_v57 = vmax.f32 %v1658_v61, %v1514_v13 }
 0x204   :  { %v1659_v15 = vmax.f32 %v1651_v14, %v1529_v1  ;;  %v1644_v38 = vmax.f32 %v2451_v22, %v1543_v18  ;;  %v1544_v23 = vmax.f32 %v1224_v6, 0.0  ;;  %v1228_v4 = vadd.f32 %v1227_v30, %v2320_v60 }
 0x205   :  { %v1229_v32 = vpop.f32.mrf.mxu0  ;;  %v2471_v43 = vpop.f32.mrf.mxu1  ;;  %v1545_v21 = vmax.f32 %v1295_v51, 0.0  ;;  %v1546_v39 = vmax.f32 %v2494_v40, 0.0  ;;  %v2507_v37 = vadd.f32 %v1300_v10, %v2320_v60 }
 0x206   :  { %v2510_v30 = vmax.f32 %v1659_v15, %v1530_v50  ;;  %v1652_v26 = vmax.f32 %v1644_v38, %v1544_v23  ;;  %v1559_v48 = vmax.f32 %v1228_v4, 0.0  ;;  %v1230_v54 = vadd.f32 %v1229_v32, %v2320_v60 }
 0x207   :  { %v2478_v56 = vpop.f32.mrf.mxu0  ;;  %v2480_v34 = vpop.f32.mrf.mxu1  ;;  %v1561_v28 = vmax.f32 %v2507_v37, 0.0  ;;  %v2519_v14 = vadd.f32 %v2471_v43, %v2320_v60 }
 0x208   :  { %v1232_v51 = vadd.f32 %v2478_v56, %v2328_v9  ;;  %v1645_v38 = vmax.f32 %v2476_v3, %v1559_v48 }
 0x209   :  { %v2486_v42 = vpop.f32.mrf.mxu0  ;;  %v2488_v0 = vpop.f32.mrf.mxu1 }
 0x20a   :  { %v1234_v3 = vadd.f32 %v2486_v42, %v2328_v9 }
 0x20b   :  { %v1343_v41 = vpop.f32.mrf.mxu0  ;;  %v1416_v35 = vpop.f32.mrf.mxu1 }
 0x20c   :  { %v1344_v47 = vadd.f32 %v1343_v41, %v2281_v36  ;;  %v1417_v27 = vadd.f32 %v1416_v35, %v2281_v36 }
 0x20d   :  { %v1345_v16 = vpop.f32.mrf.mxu0  ;;  %v1418_v25 = vpop.f32.mrf.mxu1 }
 0x20e   :  { %v1467_v44 = vmax.f32 %v1344_v47, 0.0  ;;  %v1346_v31 = vadd.f32 %v1345_v16, %v2281_v36  ;;  %v1419_v22 = vadd.f32 %v1418_v25, %v2281_v36  ;;  %v1469_v10 = vmax.f32 %v1417_v27, 0.0 }
 0x20f   :  { %v1347_v5 = vpop.f32.mrf.mxu0  ;;  %v1420_v58 = vpop.f32.mrf.mxu1 }
 0x210   :  { %v1671_v53 = vmax.f32 %v1663_v12, %v1467_v44  ;;  %v1468_v20 = vmax.f32 %v1346_v31, 0.0  ;;  %v1348_v45 = vadd.f32 %v1347_v5, %v2284_v29  ;;  %v1421_v52 = vadd.f32 %v1420_v58, %v2284_v29 }
 0x211   :  { %v1349_v8 = vpop.f32.mrf.mxu0  ;;  %v1422_v55 = vpop.f32.mrf.mxu1  ;;  %v1470_v11 = vmax.f32 %v1419_v22, 0.0  ;;  %v1660_v12 = vmax.f32 %v1652_v26, %v1545_v21  ;;  %v1575_v21 = vmax.f32 %v1232_v51, 0.0 }
 0x212   :  { %v1679_v62 = vmax.f32 %v1671_v53, %v1468_v20  ;;  %v1483_v17 = vmax.f32 %v1348_v45, 0.0  ;;  %v1350_v36 = vadd.f32 %v1349_v8, %v2284_v29  ;;  %v1423_v33 = vadd.f32 %v1422_v55, %v2284_v29 }
 0x213   :  { %v1353_v18 = vpop.f32.mrf.mxu0  ;;  %v1426_v32 = vpop.f32.mrf.mxu1  ;;  %v1485_v41 = vmax.f32 %v1421_v52, 0.0 }
 0x214   :  { %v1687_v6 = vmax.f32 %v1679_v62, %v1469_v10  ;;  %v1672_v7 = vmax.f32 %v1664_v24, %v1483_v17  ;;  %v1484_v61 = vmax.f32 %v1350_v36, 0.0  ;;  %v1354_v1 = vadd.f32 %v1353_v18, %v2292_v46 }
 0x215   :  { %v1427_v35 = vadd.f32 %v1426_v32, %v2292_v46  ;;  %v1355_v13 = vpop.f32.mrf.mxu0  ;;  %v1428_v43 = vpop.f32.mrf.mxu1  ;;  %v1560_v24 = vmax.f32 %v1230_v54, 0.0  ;;  %v1486_v23 = vmax.f32 %v1423_v33, 0.0  ;;  %v1646_v36 = vmax.f32 %v2490_v63, %v1575_v21 }
 0x216   :  { %v1695_v15 = vmax.f32 %v1687_v6, %v1470_v11  ;;  %v1680_v47 = vmax.f32 %v1672_v7, %v1484_v61  ;;  %v1499_v50 = vmax.f32 %v1354_v1, 0.0  ;;  %v1356_v29 = vadd.f32 %v1355_v13, %v2292_v46 }
 0x217   :  { %v1429_v4 = vadd.f32 %v1428_v43, %v2292_v46  ;;  %v1357_v16 = vpop.f32.mrf.mxu0  ;;  %v1430_v25 = vpop.f32.mrf.mxu1  ;;  %v1501_v22 = vmax.f32 %v1427_v35, 0.0  ;;  %v1653_v48 = vmax.f32 %v1645_v38, %v1560_v24  ;;  %v1576_v11 = vmax.f32 %v1234_v3, 0.0 }
 0x218   :  { %1703 = vst [vmem:[%s2593_s5] sm:$0xff] %v1695_v15  ;;  %v1688_v56 = vmax.f32 %v1680_v47, %v1485_v41  ;;  %v1673_v44 = vmax.f32 %v2496_v49, %v1499_v50  ;;  %v1500_v27 = vmax.f32 %v1356_v29, 0.0  ;;  %v1358_v31 = vadd.f32 %v1357_v16, %v2296_v59 }
 0x219   :  { %v1431_v5 = vadd.f32 %v1430_v25, %v2296_v59  ;;  %v1359_v46 = vpop.f32.mrf.mxu0  ;;  %v1432_v58 = vpop.f32.mrf.mxu1  ;;  %v1562_v49 = vmax.f32 %v2519_v14, 0.0  ;;  %v1502_v54 = vmax.f32 %v1429_v4, 0.0  ;;  %v1668_v1 = vmax.f32 %v1660_v12, %v1546_v39 }
 0x21a   :  { %v1696_v53 = vmax.f32 %v1688_v56, %v1486_v23  ;;  %v1681_v20 = vmax.f32 %v1673_v44, %v1500_v27  ;;  %v1515_v45 = vmax.f32 %v1358_v31, 0.0  ;;  %v1360_v26 = vadd.f32 %v1359_v46, %v2296_v59 }
 0x21b   :  { %v1433_v52 = vadd.f32 %v1432_v58, %v2296_v59  ;;  %v1363_v8 = vpop.f32.mrf.mxu0  ;;  %v1436_v55 = vpop.f32.mrf.mxu1  ;;  %v1517_v33 = vmax.f32 %v1431_v5, 0.0  ;;  %v1661_v40 = vmax.f32 %v1653_v48, %v1561_v28  ;;  %v1654_v39 = vmax.f32 %v1646_v36, %v1576_v11 }
 0x21c   :  { %1704 = vst [vmem:[%s2593_s5 + $0x8] sm:$0xff] %v1696_v53  ;;  %v1689_v42 = vmax.f32 %v1681_v20, %v1501_v22  ;;  %v1674_v10 = vmax.f32 %v2501_v57, %v1515_v45  ;;  %v1516_v62 = vmax.f32 %v1360_v26, 0.0  ;;  %v1364_v17 = vadd.f32 %v1363_v8, %v2304_v19 }
 0x21d   :  { %v1437_v14 = vadd.f32 %v1436_v55, %v2304_v19  ;;  %v1365_v18 = vpop.f32.mrf.mxu0  ;;  %v1438_v59 = vpop.f32.mrf.mxu1  ;;  %v1305_v57 = vadd.f32 %v2480_v34, %v2328_v9  ;;  %v1518_v51 = vmax.f32 %v1433_v52, 0.0  ;;  %v1669_v21 = vmax.f32 %v1661_v40, %v1562_v49 }
 0x21e   :  { %v1697_v32 = vmax.f32 %v1689_v42, %v1502_v54  ;;  %v1682_v6 = vmax.f32 %v1674_v10, %v1516_v62  ;;  %v1531_v7 = vmax.f32 %v1364_v17, 0.0  ;;  %v1366_v61 = vadd.f32 %v1365_v18, %v2304_v19 }
 0x21f   :  { %v1439_v63 = vadd.f32 %v1438_v59, %v2304_v19  ;;  %v1367_v41 = vpop.f32.mrf.mxu0  ;;  %v1440_v35 = vpop.f32.mrf.mxu1  ;;  %v1533_v34 = vmax.f32 %v1437_v14, 0.0  ;;  %v1577_v4 = vmax.f32 %v1305_v57, 0.0 }
 0x220   :  { %1705 = vst [vmem:[%s2593_s5 + $0x10] sm:$0xff] %v1697_v32  ;;  %v1690_v13 = vmax.f32 %v1682_v6, %v1517_v33  ;;  %v1675_v43 = vmax.f32 %v2510_v30, %v1531_v7  ;;  %v1532_v15 = vmax.f32 %v1366_v61, 0.0  ;;  %v1368_v47 = vadd.f32 %v1367_v41, %v2316_v2 }
 0x221   :  { %v1441_v12 = vadd.f32 %v1440_v35, %v2316_v2  ;;  %v1369_v19 = vpop.f32.mrf.mxu0  ;;  %v1442_v50 = vpop.f32.mrf.mxu1  ;;  %v1307_v30 = vadd.f32 %v2488_v0, %v2328_v9  ;;  %v1534_v16 = vmax.f32 %v1439_v63, 0.0  ;;  %v1662_v3 = vmax.f32 %v1654_v39, %v1577_v4 }
 0x222   :  { %v1698_v29 = vmax.f32 %v1690_v13, %v1518_v51  ;;  %v1683_v38 = vmax.f32 %v1675_v43, %v1532_v15  ;;  %v1547_v24 = vmax.f32 %v1368_v47, 0.0  ;;  %v1370_v23 = vadd.f32 %v1369_v19, %v2316_v2 }
 0x223   :  { %v1443_v25 = vadd.f32 %v1442_v50, %v2316_v2  ;;  %v1373_v37 = vpop.f32.mrf.mxu0  ;;  %v1446_v28 = vpop.f32.mrf.mxu1  ;;  %v1549_v22 = vmax.f32 %v1441_v12, 0.0  ;;  %v1578_v45 = vmax.f32 %v1307_v30, 0.0 }
 0x224   :  { %1706 = vst [vmem:[%s2593_s5 + $0x18] sm:$0xff] %v1698_v29  ;;  %v1691_v56 = vmax.f32 %v1683_v38, %v1533_v34  ;;  %v1676_v44 = vmax.f32 %v1668_v1, %v1547_v24  ;;  %v1548_v27 = vmax.f32 %v1370_v23, 0.0  ;;  %v1374_v31 = vadd.f32 %v1373_v37, %v2320_v60 }
 0x225   :  { %v1447_v5 = vadd.f32 %v1446_v28, %v2320_v60  ;;  %v1375_v0 = vpop.f32.mrf.mxu0  ;;  %v1448_v46 = vpop.f32.mrf.mxu1  ;;  %v1550_v26 = vmax.f32 %v1443_v25, 0.0  ;;  %v1670_v10 = vmax.f32 %v1662_v3, %v1578_v45 }
 0x226   :  { %v1699_v58 = vmax.f32 %v1691_v56, %v1534_v16  ;;  %v1684_v2 = vmax.f32 %v1676_v44, %v1548_v27  ;;  %v1563_v53 = vmax.f32 %v1374_v31, 0.0  ;;  %v1376_v20 = vadd.f32 %v1375_v0, %v2320_v60 }
 0x227   :  { %v1449_v48 = vadd.f32 %v1448_v46, %v2320_v60  ;;  %v1377_v54 = vpop.f32.mrf.mxu0  ;;  %v1450_v52 = vpop.f32.mrf.mxu1  ;;  %v1565_v62 = vmax.f32 %v1447_v5, 0.0 }
 0x228   :  { %1707 = vst [vmem:[%s2593_s5 + $0x20] sm:$0xff] %v1699_v58  ;;  %v1692_v49 = vmax.f32 %v1684_v2, %v1549_v22  ;;  %v1677_v8 = vmax.f32 %v1669_v21, %v1563_v53  ;;  %v1564_v55 = vmax.f32 %v1376_v20, 0.0  ;;  %v1378_v42 = vadd.f32 %v1377_v54, %v2328_v9 }
 0x229   :  { %v1451_v17 = vadd.f32 %v1450_v52, %v2328_v9  ;;  %v1379_v36 = vpop.f32.mrf.mxu0  ;;  %v1452_v11 = vpop.f32.mrf.mxu1  ;;  %v1566_v59 = vmax.f32 %v1449_v48, 0.0 }
 0x22a   :  { %v1700_v33 = vmax.f32 %v1692_v49, %v1550_v26  ;;  %v1685_v14 = vmax.f32 %v1677_v8, %v1564_v55  ;;  %v1579_v60 = vmax.f32 %v1378_v42, 0.0  ;;  %v1380_v18 = vadd.f32 %v1379_v36, %v2328_v9 }
 0x22b   :  { %v1453_v61 = vadd.f32 %v1452_v11, %v2328_v9  ;;  %v1581_v57 = vmax.f32 %v1451_v17, 0.0 }
 0x22c   :  { %1708 = vst [vmem:[%s2593_s5 + $0x28] sm:$0xff] %v1700_v33  ;;  %v1693_v32 = vmax.f32 %v1685_v14, %v1565_v62  ;;  %v1678_v6 = vmax.f32 %v1670_v10, %v1579_v60  ;;  %v1580_v7 = vmax.f32 %v1380_v18, 0.0 }
 0x22d   :  { %v1582_v63 = vmax.f32 %v1453_v61, 0.0 }
 0x22e   :  { %v1701_v1 = vmax.f32 %v1693_v32, %v1566_v59  ;;  %v1686_v51 = vmax.f32 %v1678_v6, %v1580_v7 }
 0x230   :  { %1709 = vst [vmem:[%s2593_s5 + $0x30] sm:$0xff] %v1701_v1  ;;  %v1694_v41 = vmax.f32 %v1686_v51, %v1581_v57 }
 0x232   :  { %v1702_v35 = vmax.f32 %v1694_v41, %v1582_v63 }
 0x234   :  { %1710 = vst [vmem:[%s2593_s5 + $0x38] sm:$0xff] %v1702_v35 }

</bundles_post_ra>
